<compile_context>
chip_gen: v6e
topology: v6e:2x2x1
jax: 0.10.0
libtpu: 0.0.40
codegen_flags: <defaults>
</compile_context>

<pallas_src>
import functools

import numpy as np
import jax
import jax.numpy as jnp
from jax.experimental import pallas as pl
from jax.experimental.pallas import tpu as pltpu

# ---------------------------------------------------------------------------
# static configuration (mirrors `cfg` / `dataset` attributes of the module)
# ---------------------------------------------------------------------------
H, W, C_IN = 16, 16, 3          # image spatial / channels
HW = H * W                      # 256 (lane aligned)
K_RAW = 9 * C_IN                # im2col contraction dim (27)
K_PAD = 32                      # padded contraction dim (sublane aligned)
FEAT_C = 128                    # backbone feature channels (lane dense)
POOL = 4                        # RoI pooling grid (POOL x POOL)
SAMPLES = POOL * POOL           # 16
VIS_FEAT_DIM = 128              # mask_rcnn.output_feat_dim (lane dense)
NUM_COCO = 12                   # number of raw detector ("coco") classes
NUM_OBJECTS = 10                # dataset.num_objects (hico objects)
HICO_TO_COCO = np.arange(1, NUM_OBJECTS + 1)   # dataset.hico_to_coco_mapping
HUMAN_CLASS = 0                 # dataset.human_class (hico index)
HUM_THR = 0.3                   # cfg.hum_thr
OBJ_THR = 0.3                   # cfg.obj_thr

# fixed RoI-row buckets -> only a handful of jit traces / Mosaic compiles
ROI_BUCKETS = (32, 64, 128, 256)


def _bucket_rows(n_total):
    for b in ROI_BUCKETS:
        if n_total <= b:
            return b
    return int(np.ceil(n_total / 128)) * 128


# ---------------------------------------------------------------------------
# Fused Pallas kernel: backbone conv + batched one-hot RoI gather + RoI head
# ---------------------------------------------------------------------------
def _fused_backbone_roi_kernel(a_ref, wc_ref, idx_ref, wroi_ref, out_ref, *,
                               m_pad):
    rows = SAMPLES * m_pad

    # 1) backbone: 3x3 conv as im2col matmul (bf16 operands, f32 acc) + ReLU.
    #    `feat` stays in VMEM/vregs — it never goes back to HBM.
    feat = jnp.maximum(
        jnp.dot(a_ref[...], wc_ref[...], preferred_element_type=jnp.float32),
        0.0).astype(jnp.bfloat16)                              # (HW, FEAT_C)

    # 2) batched one-hot gather: ONE (rows, HW) @ (HW, FEAT_C) MXU matmul.
    #    idx is sample-major flattened: row s*m_pad + r == sample s of RoI r.
    #    Padded RoI rows carry idx == -1 -> all-zero one-hot -> zero output.
    iota = jax.lax.broadcasted_iota(jnp.int32, (rows, HW), 1)
    onehot = (iota == jnp.broadcast_to(idx_ref[...], (rows, HW))
              ).astype(jnp.bfloat16)                           # (rows, HW)
    gathered = jnp.dot(onehot, feat,
                       preferred_element_type=jnp.float32
                       ).astype(jnp.bfloat16)                  # (rows, FEAT_C)

    # 3) RoI head, scratch-free: 16 accumulating (m_pad,128)@(128,128) matmuls
    #    over contiguous, sublane-aligned static slices; f32 accumulator lives
    #    in vregs; one unmasked lane-dense store at the end.
    acc = jnp.zeros((m_pad, VIS_FEAT_DIM), jnp.float32)
    for s in range(SAMPLES):
        acc = acc + jnp.dot(gathered[s * m_pad:(s + 1) * m_pad, :],
                            wroi_ref[s * FEAT_C:(s + 1) * FEAT_C, :],
                            preferred_element_type=jnp.float32)
    out_ref[...] = acc


def _im2col(image_nchw):
    # XLA glue: NCHW -> NHWC, 3x3 patch extraction (ky, kx, c order matching
    # conv_w.reshape(K_RAW, FEAT_C)), K padded 27 -> 32.
    x = jnp.transpose(image_nchw, (0, 2, 3, 1))
    xp = jnp.pad(x, ((0, 0), (1, 1), (1, 1), (0, 0)))
    patches = jnp.concatenate(
        [xp[:, ky:ky + H, kx:kx + W, :] for ky in range(3) for kx in range(3)],
        axis=-1)                                               # (1, H, W, 9*C_IN)
    a = patches.reshape(HW, K_RAW).astype(jnp.float32)
    return jnp.pad(a, ((0, 0), (0, K_PAD - K_RAW)))            # (HW, K_PAD)


def prepare_params(conv_w, w_roi):
    """One-time host-side parameter prep: reshape/pad + bf16 cast + upload."""
    wc = jnp.pad(jnp.asarray(conv_w, jnp.float32).reshape(K_RAW, FEAT_C),
                 ((0, K_PAD - K_RAW), (0, 0))).astype(jnp.bfloat16)
    wr = jnp.asarray(w_roi, jnp.float32).astype(jnp.bfloat16)
    return {"wc": jax.device_put(wc), "w_roi": jax.device_put(wr)}


@jax.jit
def device_forward(image_nchw, wc_bf16, wroi_bf16, idx_flat):
    """Single device program: im2col glue + one fused pallas_call."""
    m_pad = idx_flat.shape[0] // SAMPLES
    a_pad = _im2col(image_nchw).astype(jnp.bfloat16)           # (HW, K_PAD)

    return pl.pallas_call(
        functools.partial(_fused_backbone_roi_kernel, m_pad=m_pad),
        out_shape=jax.ShapeDtypeStruct((m_pad, VIS_FEAT_DIM), jnp.float32),
        grid=(1,),   # whole problem is tiny; one grid step = one launch
        in_specs=[
            pl.BlockSpec((HW, K_PAD), lambda i: (0, 0)),
            pl.BlockSpec((K_PAD, FEAT_C), lambda i: (0, 0)),
            pl.BlockSpec((SAMPLES * m_pad, 1), lambda i: (0, 0)),
            pl.BlockSpec((SAMPLES * FEAT_C, VIS_FEAT_DIM), lambda i: (0, 0)),
        ],
        out_specs=pl.BlockSpec((m_pad, VIS_FEAT_DIM), lambda i: (0, 0)),
        compiler_params=pltpu.CompilerParams(
            dimension_semantics=("arbitrary",)),
    )(a_pad, wc_bf16, idx_flat, wroi_bf16)


# ---------------------------------------------------------------------------
# Host-side numpy box logic (mirrors the original module)
# ---------------------------------------------------------------------------
def _roi_sample_indices(rois_np):
    # rois_np: [M, 5] = (im_id, x1, y1, x2, y2) in feature-map coords (scale=1)
    x1, y1 = rois_np[:, 1], rois_np[:, 2]
    x2, y2 = rois_np[:, 3], rois_np[:, 4]
    bw = (x2 - x1) / POOL
    bh = (y2 - y1) / POOL
    iy, ix = np.meshgrid(np.arange(POOL), np.arange(POOL), indexing="ij")
    ys = y1[:, None, None] + (iy[None] + 0.5) * bh[:, None, None]
    xs = x1[:, None, None] + (ix[None] + 0.5) * bw[:, None, None]
    yi = np.clip(np.floor(ys), 0, H - 1).astype(np.int32)
    xi = np.clip(np.floor(xs), 0, W - 1).astype(np.int32)
    return (yi * W + xi).reshape(rois_np.shape[0], SAMPLES)


def _build_idx_flat(rois_np):
    """Sample-major flattened sample-index table, padded to a fixed bucket."""
    idx = _roi_sample_indices(rois_np)                  # (n_total, SAMPLES)
    n_total = idx.shape[0]
    m_pad = _bucket_rows(n_total)
    idx_pad = np.full((m_pad, SAMPLES), -1, dtype=np.int32)   # -1 => zero rows
    idx_pad[:n_total] = idx
    idx_flat = np.ascontiguousarray(idx_pad.T).reshape(SAMPLES * m_pad, 1)
    return jnp.asarray(idx_flat), m_pad


def filter_boxes(boxes_ext_np, coco_box_classes):
    keep = np.ones(boxes_ext_np.shape[0], dtype=bool)
    keep &= coco_box_classes > 0
    box_classes = np.argmax(boxes_ext_np[:, 5:], axis=1)
    max_scores = np.max(boxes_ext_np[:, 5:], axis=1)
    human_boxes = box_classes == HUMAN_CLASS
    keep &= (human_boxes & (max_scores >= HUM_THR)
             | ~human_boxes & (max_scores >= OBJ_THR))
    if not np.any(keep):
        return boxes_ext_np[:1, :]
    return boxes_ext_np[keep, :]


def get_all_pairs(boxes_ext, box_classes):
    human_box_inds = box_classes == HUMAN_CLASS
    if human_box_inds.size == 0:
        return np.empty([0, 3], dtype=np.int64)
    block_img_mat = boxes_ext[:, 0][:, None] == boxes_ext[:, 0][None, :]
    possible_rels_mat = (block_img_mat.astype(np.float64)
                         - np.eye(block_img_mat.shape[0]))
    possible_rels_mat[~human_box_inds, :] = 0
    hum_inds, obj_inds = np.where(possible_rels_mat)
    hoi_im_ids = boxes_ext[hum_inds, 0]
    return np.stack([hoi_im_ids, hum_inds, obj_inds], axis=1).astype(np.int64)


def get_union_boxes(boxes_np, ho_pairs_np):
    # trivial elementwise min/max on host (boxes already live there).
    hb = boxes_np[ho_pairs_np[:, 0]]
    ob = boxes_np[ho_pairs_np[:, 1]]
    return np.concatenate([np.minimum(hb[:, :2], ob[:, :2]),
                           np.maximum(hb[:, 2:4], ob[:, 2:4])],
                          axis=1).astype(np.float32)


# ---------------------------------------------------------------------------
# VisualModule forward (inference path)
# ---------------------------------------------------------------------------
def visual_module_forward(image_nchw, boxes_ext_np, prepped_params):
    output = {}
    output["scale"] = 1.0

    boxes_ext_np = np.asarray(boxes_ext_np, dtype=np.float32)
    if boxes_ext_np.shape[0] == 0:
        return output

    # --- process_boxes (inference branch), host numpy as in the original ---
    coco_box_classes = np.argmax(boxes_ext_np[:, 5:], axis=1)
    boxes_ext_np = boxes_ext_np[:, np.concatenate([np.arange(5),
                                                   5 + HICO_TO_COCO])]
    boxes_ext_np = filter_boxes(boxes_ext_np, coco_box_classes)
    assert boxes_ext_np.shape[0] > 0
    box_classes = np.argmax(boxes_ext_np[:, 5:], axis=1)
    inds = np.argsort(boxes_ext_np[:, 0], kind="stable").astype(np.int64)
    boxes_ext_np = boxes_ext_np[inds]
    box_classes = box_classes[inds]
    ho_infos = get_all_pairs(boxes_ext_np, box_classes)

    n_boxes = boxes_ext_np.shape[0]
    n_pairs = ho_infos.shape[0]

    # --- batch box RoIs and HOI-union RoIs into ONE fused kernel call ---
    rois_list = [boxes_ext_np[:, :5]]
    hoi_union_boxes = None
    if n_pairs > 0:
        hoi_union_boxes = get_union_boxes(boxes_ext_np[:, 1:5], ho_infos[:, 1:])
        union_rois = np.concatenate(
            [ho_infos[:, :1].astype(np.float32), hoi_union_boxes], axis=1)
        rois_list.append(union_rois)
    rois_all = np.concatenate(rois_list, axis=0)

    idx_flat, _ = _build_idx_flat(rois_all)

    feats_all = device_forward(image_nchw, prepped_params["wc"],
                               prepped_params["w_roi"], idx_flat)
    # feats_all: (m_pad, VIS_FEAT_DIM); padded tail rows are exactly zero.

    box_feats = feats_all[:n_boxes]
    output["boxes_ext"] = jnp.asarray(boxes_ext_np, jnp.float32)
    output["box_feats"] = box_feats
    output["box_labels"] = None
    output["action_labels"] = None
    assert n_boxes == box_feats.shape[0]

    if n_pairs > 0:
        output["ho_infos_np"] = ho_infos
        output["hoi_union_boxes"] = hoi_union_boxes
        output["hoi_union_boxes_feats"] = feats_all[n_boxes:n_boxes + n_pairs]
        assert n_pairs == output["hoi_union_boxes_feats"].shape[0]
    return output


# ---------------------------------------------------------------------------
# main
# ---------------------------------------------------------------------------
if __name__ == "__main__":
    key = jax.random.PRNGKey(0)
    k_img, k_box, k_conv, k_roi = jax.random.split(key, 4)

    # image: PyTorch-style NCHW
    image = jax.random.normal(k_img, (1, C_IN, H, W), dtype=jnp.float32)

    # deterministic parameters (synthetic, no checkpoint)
    conv_w = 0.1 * jax.random.normal(k_conv, (3, 3, C_IN, FEAT_C), jnp.float32)
    w_roi = 0.05 * jax.random.normal(k_roi, (SAMPLES * FEAT_C, VIS_FEAT_DIM),
                                     jnp.float32)
    params = prepare_params(conv_w, w_roi)   # one-time prep (reshape/pad/bf16)

    # synthetic detections (stand-in for GenRCNN detection head output)
    N_DET = 8
    bxy = np.asarray(jax.random.uniform(k_box, (N_DET, 2), minval=0.0,
                                        maxval=8.0))
    bwh = np.asarray(jax.random.uniform(jax.random.fold_in(k_box, 1),
                                        (N_DET, 2), minval=4.0, maxval=8.0))
    boxes = np.concatenate([bxy, np.clip(bxy + bwh, 0.0, float(H) - 1.0)],
                           axis=1)                         # [N, 4] x1,y1,x2,y2
    det_coco_cls = np.array([1, 1, 1, 3, 4, 5, 6, 2])      # 3 humans (coco 1)
    scores = np.full((N_DET, NUM_COCO), 0.02, dtype=np.float32)
    scores[np.arange(N_DET), det_coco_cls] = 0.9
    im_ids = np.zeros((N_DET, 1), dtype=np.float32)
    boxes_ext_np = np.concatenate([im_ids, boxes.astype(np.float32), scores],
                                  axis=1)                  # [N, 5 + NUM_COCO]

    out = visual_module_forward(image, boxes_ext_np, params)

    jax.block_until_ready(out["box_feats"])
    jax.block_until_ready(out["hoi_union_boxes_feats"])

    assert out["box_feats"].shape == (out["boxes_ext"].shape[0], VIS_FEAT_DIM)
    assert out["hoi_union_boxes_feats"].shape == (out["ho_infos_np"].shape[0],
                                                  VIS_FEAT_DIM)
    assert bool(jnp.all(jnp.isfinite(out["box_feats"])))
    assert bool(jnp.all(jnp.isfinite(out["hoi_union_boxes_feats"])))
    print("KERNEL_OK")
</pallas_src>

<mosaic_0001>
module attributes {stable_mosaic.version = 11 : i64} {
  func.func @_fused_backbone_roi_kernel(%arg0: i32, %arg1: memref<256x32xbf16, #tpu.memory_space<vmem>>, %arg2: memref<32x128xbf16, #tpu.memory_space<vmem>>, %arg3: memref<512x1xi32, #tpu.memory_space<vmem>>, %arg4: memref<2048x128xbf16, #tpu.memory_space<vmem>>, %arg5: memref<32x128xf32, #tpu.memory_space<vmem>>) attributes {dimension_semantics = [#tpu.dimension_semantics<arbitrary>], iteration_bounds = array<i64: 1>, scalar_prefetch = 0 : i64, scratch_operands = 0 : i64, tpu.core_type = #tpu.core_type<tc>, window_params = [{pipeline_mode = #tpu.pipeline_mode<synchronous>, transform_indices = @transform_0, window_bounds = array<i64: 256, 32>}, {pipeline_mode = #tpu.pipeline_mode<synchronous>, transform_indices = @transform_1, window_bounds = array<i64: 32, 128>}, {pipeline_mode = #tpu.pipeline_mode<synchronous>, transform_indices = @transform_2, window_bounds = array<i64: 512, 1>}, {pipeline_mode = #tpu.pipeline_mode<synchronous>, transform_indices = @transform_3, window_bounds = array<i64: 2048, 128>}, {pipeline_mode = #tpu.pipeline_mode<synchronous>, transform_indices = @transform_4, window_bounds = array<i64: 32, 128>}]} {
    %c0 = arith.constant 0 : index
    %c0_0 = arith.constant 0 : index
    %0 = vector.load %arg1[%c0, %c0_0] : memref<256x32xbf16, #tpu.memory_space<vmem>>, vector<256x32xbf16>
    %c0_1 = arith.constant 0 : index
    %c0_2 = arith.constant 0 : index
    %1 = vector.load %arg2[%c0_1, %c0_2] : memref<32x128xbf16, #tpu.memory_space<vmem>>, vector<32x128xbf16>
    %cst = arith.constant dense<0.000000e+00> : vector<256x128xf32>
    %2 = tpu.matmul %0, %1, %cst {dimension_numbers = #tpu.dot_dimension_numbers<[1], [0], [0], [1], [0, 0, 1, 1], [], []>} : vector<256x32xbf16>, vector<32x128xbf16>, vector<256x128xf32> -> vector<256x128xf32>
    %cst_3 = arith.constant 0.000000e+00 : f32
    %3 = vector.broadcast %cst_3 : f32 to vector<256x128xf32>
    %4 = arith.maximumf %2, %3 : vector<256x128xf32>
    %5 = arith.truncf %4 : vector<256x128xf32> to vector<256x128xbf16>
    %6 = tpu.iota {dimensions = array<i32: 1>} : vector<512x256xi32>
    %c0_4 = arith.constant 0 : index
    %c0_5 = arith.constant 0 : index
    %7 = vector.load %arg3[%c0_4, %c0_5] : memref<512x1xi32, #tpu.memory_space<vmem>>, vector<512x1xi32>
    %8 = vector.shape_cast %7 : vector<512x1xi32> to vector<512x1xi32>
    %9 = vector.broadcast %8 : vector<512x1xi32> to vector<512x256xi32>
    %10 = arith.cmpi eq, %6, %9 : vector<512x256xi32>
    %11 = arith.extui %10 : vector<512x256xi1> to vector<512x256xi32>
    %12 = arith.sitofp %11 : vector<512x256xi32> to vector<512x256xf32>
    %13 = arith.truncf %12 : vector<512x256xf32> to vector<512x256xbf16>
    %cst_6 = arith.constant dense<0.000000e+00> : vector<512x128xf32>
    %14 = tpu.matmul %13, %5, %cst_6 {dimension_numbers = #tpu.dot_dimension_numbers<[1], [0], [0], [1], [0, 0, 1, 1], [], []>} : vector<512x256xbf16>, vector<256x128xbf16>, vector<512x128xf32> -> vector<512x128xf32>
    %15 = arith.truncf %14 : vector<512x128xf32> to vector<512x128xbf16>
    %cst_7 = arith.constant 0.000000e+00 : f32
    %16 = vector.broadcast %cst_7 : f32 to vector<32x128xf32>
    %17 = vector.extract_strided_slice %15 {offsets = [0, 0], sizes = [32, 128], strides = [1, 1]} : vector<512x128xbf16> to vector<32x128xbf16>
    %c0_8 = arith.constant 0 : index
    %c0_9 = arith.constant 0 : index
    %18 = vector.load %arg4[%c0_8, %c0_9] : memref<2048x128xbf16, #tpu.memory_space<vmem>>, vector<128x128xbf16>
    %cst_10 = arith.constant dense<0.000000e+00> : vector<32x128xf32>
    %19 = tpu.matmul %17, %18, %cst_10 {dimension_numbers = #tpu.dot_dimension_numbers<[1], [0], [0], [1], [0, 0, 1, 1], [], []>} : vector<32x128xbf16>, vector<128x128xbf16>, vector<32x128xf32> -> vector<32x128xf32>
    %20 = arith.addf %16, %19 : vector<32x128xf32>
    %21 = vector.extract_strided_slice %15 {offsets = [32, 0], sizes = [32, 128], strides = [1, 1]} : vector<512x128xbf16> to vector<32x128xbf16>
    %c128 = arith.constant 128 : index
    %c0_11 = arith.constant 0 : index
    %22 = vector.load %arg4[%c128, %c0_11] : memref<2048x128xbf16, #tpu.memory_space<vmem>>, vector<128x128xbf16>
    %cst_12 = arith.constant dense<0.000000e+00> : vector<32x128xf32>
    %23 = tpu.matmul %21, %22, %cst_12 {dimension_numbers = #tpu.dot_dimension_numbers<[1], [0], [0], [1], [0, 0, 1, 1], [], []>} : vector<32x128xbf16>, vector<128x128xbf16>, vector<32x128xf32> -> vector<32x128xf32>
    %24 = arith.addf %20, %23 : vector<32x128xf32>
    %25 = vector.extract_strided_slice %15 {offsets = [64, 0], sizes = [32, 128], strides = [1, 1]} : vector<512x128xbf16> to vector<32x128xbf16>
    %c256 = arith.constant 256 : index
    %c0_13 = arith.constant 0 : index
    %26 = vector.load %arg4[%c256, %c0_13] : memref<2048x128xbf16, #tpu.memory_space<vmem>>, vector<128x128xbf16>
    %cst_14 = arith.constant dense<0.000000e+00> : vector<32x128xf32>
    %27 = tpu.matmul %25, %26, %cst_14 {dimension_numbers = #tpu.dot_dimension_numbers<[1], [0], [0], [1], [0, 0, 1, 1], [], []>} : vector<32x128xbf16>, vector<128x128xbf16>, vector<32x128xf32> -> vector<32x128xf32>
    %28 = arith.addf %24, %27 : vector<32x128xf32>
    %29 = vector.extract_strided_slice %15 {offsets = [96, 0], sizes = [32, 128], strides = [1, 1]} : vector<512x128xbf16> to vector<32x128xbf16>
    %c384 = arith.constant 384 : index
    %c0_15 = arith.constant 0 : index
    %30 = vector.load %arg4[%c384, %c0_15] : memref<2048x128xbf16, #tpu.memory_space<vmem>>, vector<128x128xbf16>
    %cst_16 = arith.constant dense<0.000000e+00> : vector<32x128xf32>
    %31 = tpu.matmul %29, %30, %cst_16 {dimension_numbers = #tpu.dot_dimension_numbers<[1], [0], [0], [1], [0, 0, 1, 1], [], []>} : vector<32x128xbf16>, vector<128x128xbf16>, vector<32x128xf32> -> vector<32x128xf32>
    %32 = arith.addf %28, %31 : vector<32x128xf32>
    %33 = vector.extract_strided_slice %15 {offsets = [128, 0], sizes = [32, 128], strides = [1, 1]} : vector<512x128xbf16> to vector<32x128xbf16>
    %c512 = arith.constant 512 : index
    %c0_17 = arith.constant 0 : index
    %34 = vector.load %arg4[%c512, %c0_17] : memref<2048x128xbf16, #tpu.memory_space<vmem>>, vector<128x128xbf16>
    %cst_18 = arith.constant dense<0.000000e+00> : vector<32x128xf32>
    %35 = tpu.matmul %33, %34, %cst_18 {dimension_numbers = #tpu.dot_dimension_numbers<[1], [0], [0], [1], [0, 0, 1, 1], [], []>} : vector<32x128xbf16>, vector<128x128xbf16>, vector<32x128xf32> -> vector<32x128xf32>
    %36 = arith.addf %32, %35 : vector<32x128xf32>
    %37 = vector.extract_strided_slice %15 {offsets = [160, 0], sizes = [32, 128], strides = [1, 1]} : vector<512x128xbf16> to vector<32x128xbf16>
    %c640 = arith.constant 640 : index
    %c0_19 = arith.constant 0 : index
    %38 = vector.load %arg4[%c640, %c0_19] : memref<2048x128xbf16, #tpu.memory_space<vmem>>, vector<128x128xbf16>
    %cst_20 = arith.constant dense<0.000000e+00> : vector<32x128xf32>
    %39 = tpu.matmul %37, %38, %cst_20 {dimension_numbers = #tpu.dot_dimension_numbers<[1], [0], [0], [1], [0, 0, 1, 1], [], []>} : vector<32x128xbf16>, vector<128x128xbf16>, vector<32x128xf32> -> vector<32x128xf32>
    %40 = arith.addf %36, %39 : vector<32x128xf32>
    %41 = vector.extract_strided_slice %15 {offsets = [192, 0], sizes = [32, 128], strides = [1, 1]} : vector<512x128xbf16> to vector<32x128xbf16>
    %c768 = arith.constant 768 : index
    %c0_21 = arith.constant 0 : index
    %42 = vector.load %arg4[%c768, %c0_21] : memref<2048x128xbf16, #tpu.memory_space<vmem>>, vector<128x128xbf16>
    %cst_22 = arith.constant dense<0.000000e+00> : vector<32x128xf32>
    %43 = tpu.matmul %41, %42, %cst_22 {dimension_numbers = #tpu.dot_dimension_numbers<[1], [0], [0], [1], [0, 0, 1, 1], [], []>} : vector<32x128xbf16>, vector<128x128xbf16>, vector<32x128xf32> -> vector<32x128xf32>
    %44 = arith.addf %40, %43 : vector<32x128xf32>
    %45 = vector.extract_strided_slice %15 {offsets = [224, 0], sizes = [32, 128], strides = [1, 1]} : vector<512x128xbf16> to vector<32x128xbf16>
    %c896 = arith.constant 896 : index
    %c0_23 = arith.constant 0 : index
    %46 = vector.load %arg4[%c896, %c0_23] : memref<2048x128xbf16, #tpu.memory_space<vmem>>, vector<128x128xbf16>
    %cst_24 = arith.constant dense<0.000000e+00> : vector<32x128xf32>
    %47 = tpu.matmul %45, %46, %cst_24 {dimension_numbers = #tpu.dot_dimension_numbers<[1], [0], [0], [1], [0, 0, 1, 1], [], []>} : vector<32x128xbf16>, vector<128x128xbf16>, vector<32x128xf32> -> vector<32x128xf32>
    %48 = arith.addf %44, %47 : vector<32x128xf32>
    %49 = vector.extract_strided_slice %15 {offsets = [256, 0], sizes = [32, 128], strides = [1, 1]} : vector<512x128xbf16> to vector<32x128xbf16>
    %c1024 = arith.constant 1024 : index
    %c0_25 = arith.constant 0 : index
    %50 = vector.load %arg4[%c1024, %c0_25] : memref<2048x128xbf16, #tpu.memory_space<vmem>>, vector<128x128xbf16>
    %cst_26 = arith.constant dense<0.000000e+00> : vector<32x128xf32>
    %51 = tpu.matmul %49, %50, %cst_26 {dimension_numbers = #tpu.dot_dimension_numbers<[1], [0], [0], [1], [0, 0, 1, 1], [], []>} : vector<32x128xbf16>, vector<128x128xbf16>, vector<32x128xf32> -> vector<32x128xf32>
    %52 = arith.addf %48, %51 : vector<32x128xf32>
    %53 = vector.extract_strided_slice %15 {offsets = [288, 0], sizes = [32, 128], strides = [1, 1]} : vector<512x128xbf16> to vector<32x128xbf16>
    %c1152 = arith.constant 1152 : index
    %c0_27 = arith.constant 0 : index
    %54 = vector.load %arg4[%c1152, %c0_27] : memref<2048x128xbf16, #tpu.memory_space<vmem>>, vector<128x128xbf16>
    %cst_28 = arith.constant dense<0.000000e+00> : vector<32x128xf32>
    %55 = tpu.matmul %53, %54, %cst_28 {dimension_numbers = #tpu.dot_dimension_numbers<[1], [0], [0], [1], [0, 0, 1, 1], [], []>} : vector<32x128xbf16>, vector<128x128xbf16>, vector<32x128xf32> -> vector<32x128xf32>
    %56 = arith.addf %52, %55 : vector<32x128xf32>
    %57 = vector.extract_strided_slice %15 {offsets = [320, 0], sizes = [32, 128], strides = [1, 1]} : vector<512x128xbf16> to vector<32x128xbf16>
    %c1280 = arith.constant 1280 : index
    %c0_29 = arith.constant 0 : index
    %58 = vector.load %arg4[%c1280, %c0_29] : memref<2048x128xbf16, #tpu.memory_space<vmem>>, vector<128x128xbf16>
    %cst_30 = arith.constant dense<0.000000e+00> : vector<32x128xf32>
    %59 = tpu.matmul %57, %58, %cst_30 {dimension_numbers = #tpu.dot_dimension_numbers<[1], [0], [0], [1], [0, 0, 1, 1], [], []>} : vector<32x128xbf16>, vector<128x128xbf16>, vector<32x128xf32> -> vector<32x128xf32>
    %60 = arith.addf %56, %59 : vector<32x128xf32>
    %61 = vector.extract_strided_slice %15 {offsets = [352, 0], sizes = [32, 128], strides = [1, 1]} : vector<512x128xbf16> to vector<32x128xbf16>
    %c1408 = arith.constant 1408 : index
    %c0_31 = arith.constant 0 : index
    %62 = vector.load %arg4[%c1408, %c0_31] : memref<2048x128xbf16, #tpu.memory_space<vmem>>, vector<128x128xbf16>
    %cst_32 = arith.constant dense<0.000000e+00> : vector<32x128xf32>
    %63 = tpu.matmul %61, %62, %cst_32 {dimension_numbers = #tpu.dot_dimension_numbers<[1], [0], [0], [1], [0, 0, 1, 1], [], []>} : vector<32x128xbf16>, vector<128x128xbf16>, vector<32x128xf32> -> vector<32x128xf32>
    %64 = arith.addf %60, %63 : vector<32x128xf32>
    %65 = vector.extract_strided_slice %15 {offsets = [384, 0], sizes = [32, 128], strides = [1, 1]} : vector<512x128xbf16> to vector<32x128xbf16>
    %c1536 = arith.constant 1536 : index
    %c0_33 = arith.constant 0 : index
    %66 = vector.load %arg4[%c1536, %c0_33] : memref<2048x128xbf16, #tpu.memory_space<vmem>>, vector<128x128xbf16>
    %cst_34 = arith.constant dense<0.000000e+00> : vector<32x128xf32>
    %67 = tpu.matmul %65, %66, %cst_34 {dimension_numbers = #tpu.dot_dimension_numbers<[1], [0], [0], [1], [0, 0, 1, 1], [], []>} : vector<32x128xbf16>, vector<128x128xbf16>, vector<32x128xf32> -> vector<32x128xf32>
    %68 = arith.addf %64, %67 : vector<32x128xf32>
    %69 = vector.extract_strided_slice %15 {offsets = [416, 0], sizes = [32, 128], strides = [1, 1]} : vector<512x128xbf16> to vector<32x128xbf16>
    %c1664 = arith.constant 1664 : index
    %c0_35 = arith.constant 0 : index
    %70 = vector.load %arg4[%c1664, %c0_35] : memref<2048x128xbf16, #tpu.memory_space<vmem>>, vector<128x128xbf16>
    %cst_36 = arith.constant dense<0.000000e+00> : vector<32x128xf32>
    %71 = tpu.matmul %69, %70, %cst_36 {dimension_numbers = #tpu.dot_dimension_numbers<[1], [0], [0], [1], [0, 0, 1, 1], [], []>} : vector<32x128xbf16>, vector<128x128xbf16>, vector<32x128xf32> -> vector<32x128xf32>
    %72 = arith.addf %68, %71 : vector<32x128xf32>
    %73 = vector.extract_strided_slice %15 {offsets = [448, 0], sizes = [32, 128], strides = [1, 1]} : vector<512x128xbf16> to vector<32x128xbf16>
    %c1792 = arith.constant 1792 : index
    %c0_37 = arith.constant 0 : index
    %74 = vector.load %arg4[%c1792, %c0_37] : memref<2048x128xbf16, #tpu.memory_space<vmem>>, vector<128x128xbf16>
    %cst_38 = arith.constant dense<0.000000e+00> : vector<32x128xf32>
    %75 = tpu.matmul %73, %74, %cst_38 {dimension_numbers = #tpu.dot_dimension_numbers<[1], [0], [0], [1], [0, 0, 1, 1], [], []>} : vector<32x128xbf16>, vector<128x128xbf16>, vector<32x128xf32> -> vector<32x128xf32>
    %76 = arith.addf %72, %75 : vector<32x128xf32>
    %77 = vector.extract_strided_slice %15 {offsets = [480, 0], sizes = [32, 128], strides = [1, 1]} : vector<512x128xbf16> to vector<32x128xbf16>
    %c1920 = arith.constant 1920 : index
    %c0_39 = arith.constant 0 : index
    %78 = vector.load %arg4[%c1920, %c0_39] : memref<2048x128xbf16, #tpu.memory_space<vmem>>, vector<128x128xbf16>
    %cst_40 = arith.constant dense<0.000000e+00> : vector<32x128xf32>
    %79 = tpu.matmul %77, %78, %cst_40 {dimension_numbers = #tpu.dot_dimension_numbers<[1], [0], [0], [1], [0, 0, 1, 1], [], []>} : vector<32x128xbf16>, vector<128x128xbf16>, vector<32x128xf32> -> vector<32x128xf32>
    %80 = arith.addf %76, %79 : vector<32x128xf32>
    %c0_41 = arith.constant 0 : index
    %c0_42 = arith.constant 0 : index
    %81 = vector.load %arg5[%c0_41, %c0_42] : memref<32x128xf32, #tpu.memory_space<vmem>>, vector<32x128xf32>
    tpu.vector_store %arg5[%c0_41, %c0_42], %80 {strides = array<i32>} : memref<32x128xf32, #tpu.memory_space<vmem>>, vector<32x128xf32>,
    return
  }
  func.func @transform_0(%arg0: i32) -> (i32, i32) {
    %c0_i32 = arith.constant 0 : i32
    %c0_i32_0 = arith.constant 0 : i32
    %c0_i32_1 = arith.constant 0 : i32
    return %c0_i32, %c0_i32_0 : i32, i32
  }
  func.func @transform_1(%arg0: i32) -> (i32, i32) {
    %c0_i32 = arith.constant 0 : i32
    %c0_i32_0 = arith.constant 0 : i32
    %c0_i32_1 = arith.constant 0 : i32
    return %c0_i32, %c0_i32_0 : i32, i32
  }
  func.func @transform_2(%arg0: i32) -> (i32, i32) {
    %c0_i32 = arith.constant 0 : i32
    %c0_i32_0 = arith.constant 0 : i32
    %c0_i32_1 = arith.constant 0 : i32
    return %c0_i32, %c0_i32_0 : i32, i32
  }
  func.func @transform_3(%arg0: i32) -> (i32, i32) {
    %c0_i32 = arith.constant 0 : i32
    %c0_i32_0 = arith.constant 0 : i32
    %c0_i32_1 = arith.constant 0 : i32
    return %c0_i32, %c0_i32_0 : i32, i32
  }
  func.func @transform_4(%arg0: i32) -> (i32, i32) {
    %c0_i32 = arith.constant 0 : i32
    %c0_i32_0 = arith.constant 0 : i32
    %c0_i32_1 = arith.constant 0 : i32
    return %c0_i32, %c0_i32_0 : i32, i32
  }
}

</mosaic_0001>

<bundles_post_ra>
// kernel: device_forward.1
= control target key start
LH: loop header
LB: loop body
LE: loop exit
PB: predicated region body
PF: predicated region fallthrough
CT: control target
= control target key end

     0   :  { %vm147_vm0 = vcmask 261120   ;;  %v4444_v3 = vmov 0   ;;  %s5550_s0 = inlined_call_operand.vmem [shape: bf16[256,32], index: 0, kind: input, shape index: {}]   ;;  %s5551_s1 = inlined_call_operand.vmem [shape: bf16[32,128], index: 1, kind: input, shape index: {}]   ;;  %s5552_s2 = inlined_call_operand.vmem [shape: s32[512,1], index: 2, kind: input, shape index: {}]   ;;  %s5553_s3 = inlined_call_operand.vmem [shape: bf16[2048,128], index: 3, kind: input, shape index: {}]   ;;  %s5554_s4 = inlined_call_operand.hbm [shape: f32[32,128], index: 4, kind: output, shape index: {}]  }
   0x1   :  { %v4276_v0 = vld [vmem:[%s5551_s1 + $0x8] sm:$0xff]   ;;  %v4277_v1 = vld [vmem:[%s5551_s1] sm:$0xff]   ;;  %4275 = vset.pattern.permute.xlu1 %v4444_v3  ;;  %4274 = vset.pattern.permute.xlu0 %v4444_v3  ;;  %v4280_v5 = vld [vmem:[%s5550_s0 + $0x10] sm:$0xff]  }
   0x2   :  { %3913 = vmatprep.subr.bf16.mxu0 %v4276_v0  ;;  %v4278_v2 = vld [vmem:[%s5550_s0] sm:$0xff]   ;;  %1112 = vmatprep.subr.bf16.mxu1 %v4444_v3  ;;  %v4279_v4 = vld [vmem:[%s5550_s0 + $0x8] sm:$0xff]   ;;  %v4281_v6 = vld [vmem:[%s5550_s0 + $0x18] sm:$0xff]  }
   0x3   :  { %3914 = vmatpush3.bf16.msra.mxu0 %v4276_v0  ;;  %3917 = vmatprep.mubr.msk.bf16.mxu0 %vm147_vm0, %v4278_v2  ;;  %v410_v7 = vld [vmem:[%s5552_s2 + $0x10] sm:$0xff]  ;;  %v408_v8 = vld [vmem:[%s5552_s2] sm:$0xff]  ;;  %v411_v9 = vld [vmem:[%s5552_s2 + $0x18] sm:$0xff] }
   0x4   :  { %3915 = vmatprep.subr.bf16.mxu0 %v4277_v1  ;;  %479 = vperm.xlu1 %4275, %v410_v7   ;;  %v409_v10 = vld [vmem:[%s5552_s2 + $0x8] sm:$0xff]  ;;  %v4282_v11 = vld [vmem:[%s5550_s0 + $0x20] sm:$0xff]   ;;  %v415_v15 = vld [vmem:[%s5552_s2 + $0x38] sm:$0xff] }
   0x5   :  { %473 = vperm.xlu0 %4274, %v408_v8   ;;  %v413_v12 = vld [vmem:[%s5552_s2 + $0x28] sm:$0xff]  ;;  %v412_v13 = vld [vmem:[%s5552_s2 + $0x20] sm:$0xff]  ;;  %v414_v16 = vld [vmem:[%s5552_s2 + $0x30] sm:$0xff] }
   0x6   :  { %v4283_v14 = vld [vmem:[%s5550_s0 + $0x28] sm:$0xff]   ;;  %v4284_v17 = vld [vmem:[%s5550_s0 + $0x30] sm:$0xff]   ;;  %v416_v19 = vld [vmem:[%s5552_s2 + $0x40] sm:$0xff] }
   0x7   :  { %3916 = vmatpush3.bf16.msra.mxu0 %v4277_v1  ;;  %v417_v18 = vld [vmem:[%s5552_s2 + $0x48] sm:$0xff]  ;;  %v4285_v20 = vld [vmem:[%s5550_s0 + $0x38] sm:$0xff]   ;;  %v418_v22 = vld [vmem:[%s5552_s2 + $0x50] sm:$0xff] }
   0x8   :  { %482 = vperm.xlu1 %4275, %v411_v9   ;;  %v419_v21 = vld [vmem:[%s5552_s2 + $0x58] sm:$0xff]  ;;  %v4286_v23 = vld [vmem:[%s5550_s0 + $0x40] sm:$0xff]   ;;  %v421_v24 = vld [vmem:[%s5552_s2 + $0x68] sm:$0xff] }
   0x9   :  { %476 = vperm.xlu0 %4274, %v409_v10   ;;  %v420_v25 = vld [vmem:[%s5552_s2 + $0x60] sm:$0xff]  ;;  %v4287_v26 = vld [vmem:[%s5550_s0 + $0x48] sm:$0xff]   ;;  %v423_v27 = vld [vmem:[%s5552_s2 + $0x78] sm:$0xff] }
   0xa   :  { %3918 = vmatmul.mubr.msk.bf16.vlgmr.msra.gmra.mxu0 %vm147_vm0, %v4279_v4  ;;  %v422_v28 = vld [vmem:[%s5552_s2 + $0x70] sm:$0xff]  ;;  %v425_v30 = vld [vmem:[%s5552_s2 + $0x88] sm:$0xff]  ;;  %v424_v31 = vld [vmem:[%s5552_s2 + $0x80] sm:$0xff] }
   0xb   :  { %3921 = vmatprep.mubr.msk.bf16.mxu0 %vm147_vm0, %v4280_v5  ;;  %v4288_v29 = vld [vmem:[%s5550_s0 + $0x50] sm:$0xff]   ;;  %v4289_v32 = vld [vmem:[%s5550_s0 + $0x58] sm:$0xff]   ;;  %v4290_v35 = vld [vmem:[%s5550_s0 + $0x60] sm:$0xff]  }
   0xc   :  { %488 = vperm.xlu1 %4275, %v413_v12   ;;  %v427_v33 = vld [vmem:[%s5552_s2 + $0x98] sm:$0xff]  ;;  %v426_v34 = vld [vmem:[%s5552_s2 + $0x90] sm:$0xff]  ;;  %v429_v36 = vld [vmem:[%s5552_s2 + $0xa8] sm:$0xff] }
   0xd   :  { %485 = vperm.xlu0 %4274, %v412_v13   ;;  %v428_v37 = vld [vmem:[%s5552_s2 + $0xa0] sm:$0xff]  ;;  %v4291_v38 = vld [vmem:[%s5550_s0 + $0x68] sm:$0xff]   ;;  %v431_v39 = vld [vmem:[%s5552_s2 + $0xb8] sm:$0xff] }
   0xe   :  { %v430_v40 = vld [vmem:[%s5552_s2 + $0xb0] sm:$0xff]  ;;  %v433_v42 = vld [vmem:[%s5552_s2 + $0xc8] sm:$0xff]  ;;  %v432_v43 = vld [vmem:[%s5552_s2 + $0xc0] sm:$0xff] }
   0xf   :  { %v4292_v41 = vld [vmem:[%s5550_s0 + $0x70] sm:$0xff]   ;;  %v4293_v44 = vld [vmem:[%s5550_s0 + $0x78] sm:$0xff]   ;;  %v437_v47 = vld [vmem:[%s5552_s2 + $0xe8] sm:$0xff] }
  0x10   :  { %494 = vperm.xlu1 %4275, %v415_v15   ;;  %v435_v45 = vld [vmem:[%s5552_s2 + $0xd8] sm:$0xff]  ;;  %v434_v46 = vld [vmem:[%s5552_s2 + $0xd0] sm:$0xff]  ;;  %v436_v48 = vld [vmem:[%s5552_s2 + $0xe0] sm:$0xff] }
  0x11   :  { %491 = vperm.xlu0 %4274, %v414_v16   ;;  %v439_v49 = vld [vmem:[%s5552_s2 + $0xf8] sm:$0xff]  ;;  %v438_v50 = vld [vmem:[%s5552_s2 + $0xf0] sm:$0xff]  ;;  %v441_v51 = vld [vmem:[%s5552_s2 + $0x108] sm:$0xff] }
  0x12   :  { %3922 = vmatmul.mubr.msk.bf16.gmra.mxu0 %vm147_vm0, %v4281_v6  ;;  %v440_v52 = vld [vmem:[%s5552_s2 + $0x100] sm:$0xff]  ;;  %v443_v53 = vld [vmem:[%s5552_s2 + $0x118] sm:$0xff]  ;;  %v442_v54 = vld [vmem:[%s5552_s2 + $0x110] sm:$0xff] }
  0x13   :  { %3925 = vmatprep.mubr.msk.bf16.mxu0 %vm147_vm0, %v4282_v11  ;;  %v445_v55 = vld [vmem:[%s5552_s2 + $0x128] sm:$0xff]  ;;  %v444_v56 = vld [vmem:[%s5552_s2 + $0x120] sm:$0xff]  ;;  %v447_v57 = vld [vmem:[%s5552_s2 + $0x138] sm:$0xff] }
  0x14   :  { %500 = vperm.xlu1 %4275, %v417_v18   ;;  %v446_v58 = vld [vmem:[%s5552_s2 + $0x130] sm:$0xff]  ;;  %v449_v59 = vld [vmem:[%s5552_s2 + $0x148] sm:$0xff]  ;;  %v448_v60 = vld [vmem:[%s5552_s2 + $0x140] sm:$0xff] }
  0x15   :  { %497 = vperm.xlu0 %4274, %v416_v19   ;;  %v451_v61 = vld [vmem:[%s5552_s2 + $0x158] sm:$0xff]  ;;  %v450_v62 = vld [vmem:[%s5552_s2 + $0x150] sm:$0xff]  ;;  %v453_v63 = vld [vmem:[%s5552_s2 + $0x168] sm:$0xff] }
  0x16   :  { %v452_v0 = vld [vmem:[%s5552_s2 + $0x160] sm:$0xff]  ;;  %v455_v1 = vld [vmem:[%s5552_s2 + $0x178] sm:$0xff]  ;;  %v454_v2 = vld [vmem:[%s5552_s2 + $0x170] sm:$0xff] }
  0x17   :  { %v457_v4 = vld [vmem:[%s5552_s2 + $0x188] sm:$0xff]  ;;  %v456_v5 = vld [vmem:[%s5552_s2 + $0x180] sm:$0xff]  ;;  %v459_v6 = vld [vmem:[%s5552_s2 + $0x198] sm:$0xff] }
  0x18   :  { %506 = vperm.xlu1 %4275, %v419_v21   ;;  %v458_v7 = vld [vmem:[%s5552_s2 + $0x190] sm:$0xff]  ;;  %v461_v8 = vld [vmem:[%s5552_s2 + $0x1a8] sm:$0xff]  ;;  %v460_v9 = vld [vmem:[%s5552_s2 + $0x1a0] sm:$0xff] }
  0x19   :  { %503 = vperm.xlu0 %4274, %v418_v22   ;;  %v463_v10 = vld [vmem:[%s5552_s2 + $0x1b8] sm:$0xff]  ;;  %v462_v11 = vld [vmem:[%s5552_s2 + $0x1b0] sm:$0xff]  ;;  %v465_v12 = vld [vmem:[%s5552_s2 + $0x1c8] sm:$0xff] }
  0x1a   :  { %3926 = vmatmul.mubr.msk.bf16.gmra.mxu0 %vm147_vm0, %v4283_v14  ;;  %v464_v13 = vld [vmem:[%s5552_s2 + $0x1c0] sm:$0xff] }
  0x1b   :  { %3929 = vmatprep.mubr.msk.bf16.mxu0 %vm147_vm0, %v4284_v17 }
  0x1c   :  { %512 = vperm.xlu1 %4275, %v421_v24  }
  0x1d   :  { %509 = vperm.xlu0 %4274, %v420_v25  }
  0x20   :  { %518 = vperm.xlu1 %4275, %v423_v27  }
  0x21   :  { %515 = vperm.xlu0 %4274, %v422_v28  }
  0x22   :  { %3930 = vmatmul.mubr.msk.bf16.gmra.mxu0 %vm147_vm0, %v4285_v20 }
  0x23   :  { %3933 = vmatprep.mubr.msk.bf16.mxu0 %vm147_vm0, %v4286_v23 }
  0x24   :  { %524 = vperm.xlu1 %4275, %v425_v30  }
  0x25   :  { %521 = vperm.xlu0 %4274, %v424_v31  }
  0x28   :  { %530 = vperm.xlu1 %4275, %v427_v33  }
  0x29   :  { %527 = vperm.xlu0 %4274, %v426_v34  }
  0x2a   :  { %3934 = vmatmul.mubr.msk.bf16.gmra.mxu0 %vm147_vm0, %v4287_v26 }
  0x2b   :  { %3937 = vmatprep.mubr.msk.bf16.mxu0 %vm147_vm0, %v4288_v29 }
  0x2c   :  { %536 = vperm.xlu1 %4275, %v429_v36  }
  0x2d   :  { %533 = vperm.xlu0 %4274, %v428_v37  }
  0x30   :  { %542 = vperm.xlu1 %4275, %v431_v39  }
  0x31   :  { %539 = vperm.xlu0 %4274, %v430_v40  }
  0x32   :  { %3938 = vmatmul.mubr.msk.bf16.gmra.mxu0 %vm147_vm0, %v4289_v32 }
  0x33   :  { %3941 = vmatprep.mubr.msk.bf16.mxu0 %vm147_vm0, %v4290_v35 }
  0x34   :  { %548 = vperm.xlu1 %4275, %v433_v42  }
  0x35   :  { %545 = vperm.xlu0 %4274, %v432_v43  }
  0x38   :  { %554 = vperm.xlu1 %4275, %v435_v45  }
  0x39   :  { %551 = vperm.xlu0 %4274, %v434_v46  }
  0x3a   :  { %3942 = vmatmul.mubr.msk.bf16.gmra.mxu0 %vm147_vm0, %v4291_v38 }
  0x3b   :  { %3945 = vmatprep.mubr.msk.bf16.mxu0 %vm147_vm0, %v4292_v41 }
  0x3c   :  { %560 = vperm.xlu1 %4275, %v437_v47  }
  0x3d   :  { %557 = vperm.xlu0 %4274, %v436_v48  }
  0x40   :  { %566 = vperm.xlu1 %4275, %v439_v49  }
  0x41   :  { %563 = vperm.xlu0 %4274, %v438_v50  }
  0x42   :  { %3946 = vmatmul.mubr.msk.bf16.gmra.mxu0 %vm147_vm0, %v4293_v44 }
  0x44   :  { %572 = vperm.xlu1 %4275, %v441_v51  }
  0x45   :  { %569 = vperm.xlu0 %4274, %v440_v52  }
  0x48   :  { %578 = vperm.xlu1 %4275, %v443_v53  }
  0x49   :  { %575 = vperm.xlu0 %4274, %v442_v54  }
  0x4c   :  { %584 = vperm.xlu1 %4275, %v445_v55  }
  0x4d   :  { %581 = vperm.xlu0 %4274, %v444_v56  }
  0x50   :  { %590 = vperm.xlu1 %4275, %v447_v57  }
  0x51   :  { %587 = vperm.xlu0 %4274, %v446_v58  }
  0x54   :  { %596 = vperm.xlu1 %4275, %v449_v59  }
  0x55   :  { %593 = vperm.xlu0 %4274, %v448_v60  }
  0x58   :  { %602 = vperm.xlu1 %4275, %v451_v61  }
  0x59   :  { %599 = vperm.xlu0 %4274, %v450_v62  }
  0x5c   :  { %608 = vperm.xlu1 %4275, %v453_v63  }
  0x5d   :  { %605 = vperm.xlu0 %4274, %v452_v0  }
  0x60   :  { %614 = vperm.xlu1 %4275, %v455_v1  }
  0x61   :  { %611 = vperm.xlu0 %4274, %v454_v2  }
  0x64   :  { %620 = vperm.xlu1 %4275, %v457_v4  }
  0x65   :  { %617 = vperm.xlu0 %4274, %v456_v5  }
  0x68   :  { %626 = vperm.xlu1 %4275, %v459_v6  }
  0x69   :  { %623 = vperm.xlu0 %4274, %v458_v7  }
  0x6c   :  { %632 = vperm.xlu1 %4275, %v461_v8  }
  0x6d   :  { %629 = vperm.xlu0 %4274, %v460_v9  }
  0x70   :  { %638 = vperm.xlu1 %4275, %v463_v10  }
  0x71   :  { %635 = vperm.xlu0 %4274, %v462_v11  }
  0x72   :  { %9 = vsyncpa [#allocation3], 0  ;;  %v467_v14 = vld [vmem:[%s5552_s2 + $0x1d8] sm:$0xff]  ;;  %v466_v15 = vld [vmem:[%s5552_s2 + $0x1d0] sm:$0xff]  ;;  %v405_v20 = vlaneseq  ;;  %v4445_v26 = vmov 1.0|1.0  }
  0x73   :  { %v469_v16 = vld [vmem:[%s5552_s2 + $0x1e8] sm:$0xff]  ;;  %v468_v17 = vld [vmem:[%s5552_s2 + $0x1e0] sm:$0xff]  ;;  %v471_v18 = vld [vmem:[%s5552_s2 + $0x1f8] sm:$0xff] }
  0x74   :  { %644 = vperm.xlu1 %4275, %v465_v12   ;;  %v470_v19 = vld [vmem:[%s5552_s2 + $0x1f0] sm:$0xff]  ;;  %v4739_v22 = vand.u32 127, %v405_v20 }
  0x75   :  { %641 = vperm.xlu0 %4274, %v464_v13  }
  0x76   :  { %v4748_v25 = vadd.s32 128, %v4739_v22 }
  0x78   :  { %650 = vperm.xlu1 %4275, %v467_v14  }
  0x79   :  { %647 = vperm.xlu0 %4274, %v466_v15  }
  0x7c   :  { %656 = vperm.xlu1 %4275, %v469_v16  }
  0x7d   :  { %653 = vperm.xlu0 %4274, %v468_v17  }
  0x80   :  { %v474_v21 = vpop.permute.xlu0 %473  ;;  %662 = vperm.xlu1 %4275, %v471_v18  }
  0x81   :  { %659 = vperm.xlu0 %4274, %v470_v19   ;;  %vm664_vm1 = vcmp.eq.s32.totalorder %v4739_v22, %v474_v21  ;;  %vm665_vm4 = vcmp.eq.s32.totalorder %v4748_v25, %v474_v21 }
  0x84   :  { %v477_v23 = vpop.permute.xlu0 %476 }
  0x85   :  { %vm666_vm2 = vcmp.eq.s32.totalorder %v4739_v22, %v477_v23  ;;  %vm667_vm5 = vcmp.eq.s32.totalorder %v4748_v25, %v477_v23 }
  0x86   :  { %vm4743_vm3 = vmpackc.low %vm666_vm2, %vm664_vm1 }
  0x87   :  { %vm3479_vm6 = vmpackc.low %vm667_vm5, %vm665_vm4 }
  0x88   :  { %3480 = vmatprep.mubr.msk.bf16.mxu1 %vm3479_vm6, %v4445_v26 }
  0xca   :  { %v3919_v27 = vpop.f32.mrf.mxu0 }
  0xcb   :  { %v359_v10 = vmax.f32 %v3919_v27, 0.0 }
  0xcc   :  { %v4753_v28 = vpop.f32.mrf.mxu0 }
  0xcd   :  { %v357_v15 = vmax.f32 %v4753_v28, 0.0 }
  0xce   :  { %v3920_v29 = vpop.f32.mrf.mxu0 }
  0xcf   :  { %v360_v7 = vmax.f32 %v3920_v29, 0.0 }
  0xd0   :  { %v4755_v30 = vpop.f32.mrf.mxu0 }
  0xd1   :  { %v390_v12 = vpack.c.bf16 %v360_v7, %v359_v10  ;;  %v358_v13 = vmax.f32 %v4755_v30, 0.0 }
  0xd2   :  { %v3923_v31 = vpop.f32.mrf.mxu0 }
  0xd3   :  { %v363_v63 = vmax.f32 %v3923_v31, 0.0  ;;  %v389_v17 = vpack.c.bf16 %v358_v13, %v357_v15 }
  0xd4   :  { %v246_v32 = vpop.f32.mrf.mxu0 }
  0xd5   :  { %v361_v5 = vmax.f32 %v246_v32, 0.0 }
  0xd6   :  { %v3924_v33 = vpop.f32.mrf.mxu0 }
  0xd7   :  { %v364_v60 = vmax.f32 %v3924_v33, 0.0 }
  0xd8   :  { %v249_v34 = vpop.f32.mrf.mxu0 }
  0xd9   :  { %v392_v1 = vpack.c.bf16 %v364_v60, %v363_v63  ;;  %v362_v2 = vmax.f32 %v249_v34, 0.0  ;;  %v4296_v60 = vld [vmem:[%s5553_s3 + $0x68] sm:$0xff]   ;;  %v4297_v63 = vld [vmem:[%s5553_s3 + $0x60] sm:$0xff]  }
  0xda   :  { %v3927_v35 = vpop.f32.mrf.mxu0 }
  0xdb   :  { %v367_v53 = vmax.f32 %v3927_v35, 0.0  ;;  %v391_v8 = vpack.c.bf16 %v362_v2, %v361_v5  ;;  %v4298_v2 = vld [vmem:[%s5553_s3 + $0x58] sm:$0xff]  }
  0xdc   :  { %v262_v36 = vpop.f32.mrf.mxu0 }
  0xdd   :  { %v365_v58 = vmax.f32 %v262_v36, 0.0 }
  0xde   :  { %v3928_v37 = vpop.f32.mrf.mxu0 }
  0xdf   :  { %v368_v50 = vmax.f32 %v3928_v37, 0.0 }
  0xe0   :  { %v265_v38 = vpop.f32.mrf.mxu0 }
  0xe1   :  { %v394_v55 = vpack.c.bf16 %v368_v50, %v367_v53  ;;  %v366_v56 = vmax.f32 %v265_v38, 0.0 }
  0xe2   :  { %v3931_v39 = vpop.f32.mrf.mxu0 }
  0xe3   :  { %v371_v42 = vmax.f32 %v3931_v39, 0.0  ;;  %v393_v61 = vpack.c.bf16 %v366_v56, %v365_v58 }
  0xe4   :  { %v278_v40 = vpop.f32.mrf.mxu0 }
  0xe5   :  { %v369_v48 = vmax.f32 %v278_v40, 0.0 }
  0xe6   :  { %v3932_v41 = vpop.f32.mrf.mxu0 }
  0xe7   :  { %v372_v43 = vmax.f32 %v3932_v41, 0.0 }
  0xe8   :  { %v281_v44 = vpop.f32.mrf.mxu0 }
  0xe9   :  { %v370_v45 = vmax.f32 %v281_v44, 0.0  ;;  %v396_v46 = vpack.c.bf16 %v372_v43, %v371_v42  ;;  %v480_v43 = vpop.permute.xlu1 %479 }
  0xea   :  { %v4757_v47 = vpop.f32.mrf.mxu0  ;;  %vm669_vm7 = vcmp.eq.s32.totalorder %v4748_v25, %v480_v43  ;;  %vm668_vm10 = vcmp.eq.s32.totalorder %v4739_v22, %v480_v43 }
  0xeb   :  { %1113 = vmatpush1.bf16.msra.mxu1 %v396_v46  ;;  %v395_v51 = vpack.c.bf16 %v370_v45, %v369_v48  ;;  %v375_v44 = vmax.f32 %v4757_v47, 0.0 }
  0xec   :  { %v4759_v49 = vpop.f32.mrf.mxu0  ;;  %1114 = vmatprep.subr.bf16.mxu1 %v4444_v3 }
  0xed   :  { %v373_v48 = vmax.f32 %v4759_v49, 0.0  ;;  %v483_v50 = vpop.permute.xlu1 %482  ;;  %v486_v49 = vpop.permute.xlu0 %485 }
  0xee   :  { %v4762_v52 = vpop.f32.mrf.mxu0  ;;  %vm671_vm8 = vcmp.eq.s32.totalorder %v4748_v25, %v483_v50  ;;  %vm670_vm11 = vcmp.eq.s32.totalorder %v4739_v22, %v483_v50  ;;  %vm673_vm13 = vcmp.eq.s32.totalorder %v4748_v25, %v486_v49  ;;  %vm672_vm1 = vcmp.eq.s32.totalorder %v4739_v22, %v486_v49 }
  0xef   :  { %1115 = vmatpush1.bf16.msra.mxu1 %v395_v51  ;;  %v376_v41 = vmax.f32 %v4762_v52, 0.0  ;;  %vm3483_vm9 = vmpackc.low %vm671_vm8, %vm669_vm7 }
  0xf0   :  { %v4764_v54 = vpop.f32.mrf.mxu0  ;;  %1116 = vmatprep.subr.bf16.mxu1 %v4444_v3  ;;  %vm3485_vm14 = vmpackc.low %vm670_vm11, %vm668_vm10 }
  0xf1   :  { %v398_v45 = vpack.c.bf16 %v376_v41, %v375_v44  ;;  %v374_v46 = vmax.f32 %v4764_v54, 0.0  ;;  %v489_v47 = vpop.permute.xlu1 %488  ;;  %v492_v24 = vpop.permute.xlu0 %491  ;;  %v4294_v54 = vld [vmem:[%s5553_s3 + $0x78] sm:$0xff]  }
  0xf2   :  { %v3939_v57 = vpop.f32.mrf.mxu0  ;;  %vm675_vm12 = vcmp.eq.s32.totalorder %v4748_v25, %v489_v47  ;;  %vm674_vm0 = vcmp.eq.s32.totalorder %v4739_v22, %v489_v47  ;;  %vm676_vm7 = vcmp.eq.s32.totalorder %v4739_v22, %v492_v24  ;;  %3949 = vmatprep.subr.bf16.mxu0 %v4294_v54  ;;  %v4331_v47 = vld [vmem:[%s5553_s3 + $0x218] sm:$0xff]  }
  0xf3   :  { %1117 = vmatpush1.bf16.msra.mxu1 %v394_v55  ;;  %v379_v37 = vmax.f32 %v3939_v57, 0.0  ;;  %v397_v51 = vpack.c.bf16 %v374_v46, %v373_v48  ;;  %vm3487_vm15 = vmpackc.low %vm675_vm12, %vm673_vm13  ;;  %3950 = vmatpush3.bf16.msra.mxu0 %v4294_v54  ;;  %v4295_v57 = vld [vmem:[%s5553_s3 + $0x70] sm:$0xff]   ;;  %v4329_v48 = vld [vmem:[%s5553_s3 + $0x220] sm:$0xff]  }
  0xf4   :  { %v4767_v59 = vpop.f32.mrf.mxu0  ;;  %1118 = vmatprep.subr.bf16.mxu1 %v4444_v3  ;;  %vm3489_vm4 = vmpackc.low %vm674_vm0, %vm672_vm1  ;;  %3951 = vmatprep.subr.bf16.mxu0 %v4295_v57 }
  0xf5   :  { %v377_v40 = vmax.f32 %v4767_v59, 0.0  ;;  %v498_v53 = vpop.permute.xlu0 %497 }
  0xf6   :  { %v3940_v62 = vpop.f32.mrf.mxu0  ;;  %vm680_vm13 = vcmp.eq.s32.totalorder %v4739_v22, %v498_v53 }
  0xf7   :  { %1119 = vmatpush1.bf16.msra.mxu1 %v393_v61  ;;  %v380_v35 = vmax.f32 %v3940_v62, 0.0  ;;  %3952 = vmatpush3.bf16.msra.mxu0 %v4295_v57 }
  0xf8   :  { %v313_v0 = vpop.f32.mrf.mxu0  ;;  %1120 = vmatprep.subr.bf16.mxu1 %v4444_v3  ;;  %3953 = vmatprep.subr.bf16.mxu0 %v4296_v60 }
  0xf9   :  { %v400_v38 = vpack.c.bf16 %v380_v35, %v379_v37  ;;  %v378_v39 = vmax.f32 %v313_v0, 0.0  ;;  %v504_v56 = vpop.permute.xlu0 %503 }
  0xfa   :  { %v3943_v4 = vpop.f32.mrf.mxu0 }
  0xfb   :  { %1121 = vmatpush1.bf16.msra.mxu1 %v392_v1  ;;  %v383_v31 = vmax.f32 %v3943_v4, 0.0  ;;  %v399_v42 = vpack.c.bf16 %v378_v39, %v377_v40  ;;  %3954 = vmatpush3.bf16.msra.mxu0 %v4296_v60  ;;  %v4320_v40 = vld [vmem:[%s5553_s3 + $0x228] sm:$0xff]  }
  0xfc   :  { %v326_v6 = vpop.f32.mrf.mxu0  ;;  %1122 = vmatprep.subr.bf16.mxu1 %v4444_v3  ;;  %3955 = vmatprep.subr.bf16.mxu0 %v4297_v63 }
  0xfd   :  { %v381_v34 = vmax.f32 %v326_v6, 0.0  ;;  %v510_v59 = vpop.permute.xlu0 %509 }
  0xfe   :  { %v3944_v9 = vpop.f32.mrf.mxu0 }
  0xff   :  { %1123 = vmatpush1.bf16.msra.mxu1 %v391_v8  ;;  %v384_v30 = vmax.f32 %v3944_v9, 0.0  ;;  %3956 = vmatpush3.bf16.msra.mxu0 %v4297_v63  ;;  %v4299_v8 = vld [vmem:[%s5553_s3 + $0x50] sm:$0xff]  }
 0x100   :  { %v329_v11 = vpop.f32.mrf.mxu0  ;;  %1124 = vmatprep.subr.bf16.mxu1 %v4444_v3  ;;  %3957 = vmatprep.subr.bf16.mxu0 %v4298_v2 }
 0x101   :  { %v402_v32 = vpack.c.bf16 %v384_v30, %v383_v31  ;;  %v382_v33 = vmax.f32 %v329_v11, 0.0  ;;  %v516_v62 = vpop.permute.xlu0 %515  ;;  %v4300_v11 = vld [vmem:[%s5553_s3 + $0x48] sm:$0xff]   ;;  %v4311_v31 = vld [vmem:[%s5553_s3 + $0x230] sm:$0xff]  }
 0x102   :  { %v3947_v14 = vpop.f32.mrf.mxu0 }
 0x103   :  { %1125 = vmatpush1.bf16.msra.mxu1 %v390_v12  ;;  %v387_v19 = vmax.f32 %v3947_v14, 0.0  ;;  %v401_v36 = vpack.c.bf16 %v382_v33, %v381_v34  ;;  %3958 = vmatpush3.bf16.msra.mxu0 %v4298_v2  ;;  %v4301_v14 = vld [vmem:[%s5553_s3 + $0x40] sm:$0xff]  }
 0x104   :  { %v342_v16 = vpop.f32.mrf.mxu0  ;;  %1126 = vmatprep.subr.bf16.mxu1 %v4444_v3  ;;  %3959 = vmatprep.subr.bf16.mxu0 %v4299_v8 }
 0x105   :  { %v385_v29 = vmax.f32 %v342_v16, 0.0  ;;  %v522_v1 = vpop.permute.xlu0 %521 }
 0x106   :  { %v3948_v18 = vpop.f32.mrf.mxu0 }
 0x107   :  { %v388_v20 = vmax.f32 %v3948_v18, 0.0  ;;  %1127 = vmatpush1.bf16.msra.mxu1 %v389_v17  ;;  %3960 = vmatpush3.bf16.msra.mxu0 %v4299_v8  ;;  %v4890_v17 = vld [vmem:[%s5553_s3 + $0x38] sm:$0xff]  }
 0x108   :  { %v345_v21 = vpop.f32.mrf.mxu0  ;;  %1128 = vmatprep.subr.bf16.mxu1 %v4444_v3  ;;  %3961 = vmatprep.subr.bf16.mxu0 %v4300_v11  ;;  %v4302_v18 = vld [vmem:[%s5553_s3 + $0x238] sm:$0xff]  }
 0x109   :  { %v404_v23 = vpack.c.bf16 %v388_v20, %v387_v19  ;;  %v386_v27 = vmax.f32 %v345_v21, 0.0  ;;  %v528_v5 = vpop.permute.xlu0 %527 }
 0x10b   :  { %1129 = vmatpush2.bf16.msra.mxu1 %v404_v23  ;;  %v403_v28 = vpack.c.bf16 %v386_v27, %v385_v29  ;;  %3962 = vmatpush3.bf16.msra.mxu0 %v4300_v11 }
 0x10c   :  { %1130 = vmatprep.subr.bf16.mxu1 %v4444_v3  ;;  %3963 = vmatprep.subr.bf16.mxu0 %v4301_v14 }
 0x10d   :  { %v534_v7 = vpop.permute.xlu0 %533 }
 0x10f   :  { %1131 = vmatpush2.bf16.msra.mxu1 %v403_v28  ;;  %3964 = vmatpush3.bf16.msra.mxu0 %v4301_v14 }
 0x110   :  { %1132 = vmatprep.subr.bf16.mxu1 %v4444_v3  ;;  %3969 = vmatprep.subr.bf16.mxu0 %v4890_v17 }
 0x111   :  { %v540_v10 = vpop.permute.xlu0 %539 }
 0x113   :  { %1133 = vmatpush2.bf16.msra.mxu1 %v402_v32 }
 0x114   :  { %1134 = vmatprep.subr.bf16.mxu1 %v4444_v3 }
 0x115   :  { %v546_v13 = vpop.permute.xlu0 %545 }
 0x117   :  { %1135 = vmatpush2.bf16.msra.mxu1 %v401_v36 }
 0x118   :  { %1136 = vmatprep.subr.bf16.mxu1 %v4444_v3 }
 0x119   :  { %v552_v16 = vpop.permute.xlu0 %551 }
 0x11b   :  { %1137 = vmatpush2.bf16.msra.mxu1 %v400_v38 }
 0x11c   :  { %1138 = vmatprep.subr.bf16.mxu1 %v4444_v3 }
 0x11d   :  { %v558_v20 = vpop.permute.xlu0 %557 }
 0x11f   :  { %1139 = vmatpush2.bf16.msra.mxu1 %v399_v42 }
 0x120   :  { %1140 = vmatprep.subr.bf16.mxu1 %v4444_v3 }
 0x121   :  { %v564_v23 = vpop.permute.xlu0 %563 }
 0x123   :  { %1141 = vmatpush2.bf16.msra.mxu1 %v398_v45 }
 0x124   :  { %1142 = vmatprep.subr.bf16.mxu1 %v4444_v3  ;;  %v495_v3 = vpop.permute.xlu1 %494 }
 0x125   :  { %vm679_vm2 = vcmp.eq.s32.totalorder %v4748_v25, %v495_v3  ;;  %vm678_vm6 = vcmp.eq.s32.totalorder %v4739_v22, %v495_v3  ;;  %v570_v29 = vpop.permute.xlu0 %569 }
 0x126   :  { %vm3493_vm10 = vmpackc.low %vm678_vm6, %vm676_vm7 }
 0x127   :  { %1143 = vmatpush2.bf16.msra.mxu1 %v397_v51 }
 0x128   :  { %v501_v52 = vpop.permute.xlu1 %500  ;;  %4109 = vmatprep.subr.bf16.mxu1 %v4302_v18 }
 0x129   :  { %vm683_vm8 = vcmp.eq.s32.totalorder %v4748_v25, %v501_v52  ;;  %vm682_vm12 = vcmp.eq.s32.totalorder %v4739_v22, %v501_v52  ;;  %v576_v28 = vpop.permute.xlu0 %575 }
 0x12a   :  { %3482 = vmatmul.mubr.msk.bf16.vlgmr.msra.gmra.mxu1 %vm4743_vm3, %v4445_v26  ;;  %vm677_vm3 = vcmp.eq.s32.totalorder %v4748_v25, %v492_v24  ;;  %vm3497_vm0 = vmpackc.low %vm682_vm12, %vm680_vm13  ;;  %v4333_v24 = vld [vmem:[%s5553_s3 + $0x210] sm:$0xff]  }
 0x12b   :  { %3484 = vmatprep.mubr.msk.bf16.mxu1 %vm3483_vm9, %v4445_v26  ;;  %vm3491_vm5 = vmpackc.low %vm679_vm2, %vm677_vm3  ;;  %vm681_vm9 = vcmp.eq.s32.totalorder %v4748_v25, %v498_v53  ;;  %vm684_vm3 = vcmp.eq.s32.totalorder %v4739_v22, %v504_v56  ;;  %4110 = vmatpush3.bf16.msra.mxu1 %v4302_v18 }
 0x12c   :  { %vm3495_vm11 = vmpackc.low %vm683_vm8, %vm681_vm9  ;;  %v507_v55 = vpop.permute.xlu1 %506  ;;  %vm688_vm9 = vcmp.eq.s32.totalorder %v4739_v22, %v510_v59  ;;  %4111 = vmatprep.subr.bf16.mxu1 %v4311_v31 }
 0x12d   :  { %vm686_vm2 = vcmp.eq.s32.totalorder %v4739_v22, %v507_v55  ;;  %v582_v33 = vpop.permute.xlu0 %581 }
 0x12e   :  { %vm3501_vm6 = vmpackc.low %vm686_vm2, %vm684_vm3 }
 0x12f   :  { %4112 = vmatpush3.bf16.msra.mxu1 %v4311_v31 }
 0x130   :  { %v513_v58 = vpop.permute.xlu1 %512  ;;  %4113 = vmatprep.subr.bf16.mxu1 %v4320_v40 }
 0x131   :  { %vm690_vm8 = vcmp.eq.s32.totalorder %v4739_v22, %v513_v58  ;;  %v588_v35 = vpop.permute.xlu0 %587 }
 0x132   :  { %3486 = vmatmul.mubr.msk.bf16.gmra.mxu1 %vm3485_vm14, %v4445_v26  ;;  %vm687_vm14 = vcmp.eq.s32.totalorder %v4748_v25, %v507_v55  ;;  %vm3505_vm12 = vmpackc.low %vm690_vm8, %vm688_vm9 }
 0x133   :  { %3488 = vmatprep.mubr.msk.bf16.mxu1 %vm3487_vm15, %v4445_v26  ;;  %vm685_vm15 = vcmp.eq.s32.totalorder %v4748_v25, %v504_v56  ;;  %4114 = vmatpush3.bf16.msra.mxu1 %v4320_v40  ;;  %v4335_v56 = vld [vmem:[%s5553_s3 + $0x208] sm:$0xff]  }
 0x134   :  { %vm3499_vm1 = vmpackc.low %vm687_vm14, %vm685_vm15  ;;  %v519_v61 = vpop.permute.xlu1 %518  ;;  %vm692_vm15 = vcmp.eq.s32.totalorder %v4739_v22, %v516_v62  ;;  %4115 = vmatprep.subr.bf16.mxu1 %v4329_v48 }
 0x135   :  { %vm694_vm14 = vcmp.eq.s32.totalorder %v4739_v22, %v519_v61  ;;  %v594_v37 = vpop.permute.xlu0 %593 }
 0x136   :  { %vm3509_vm2 = vmpackc.low %vm694_vm14, %vm692_vm15 }
 0x137   :  { %4116 = vmatpush3.bf16.msra.mxu1 %v4329_v48 }
 0x138   :  { %v525_v0 = vpop.permute.xlu1 %524  ;;  %4117 = vmatprep.subr.bf16.mxu1 %v4331_v47 }
 0x139   :  { %v600_v39 = vpop.permute.xlu0 %599 }
 0x13a   :  { %3490 = vmatmul.mubr.msk.bf16.gmra.mxu1 %vm3489_vm4, %v4445_v26  ;;  %vm691_vm4 = vcmp.eq.s32.totalorder %v4748_v25, %v513_v58 }
 0x13b   :  { %3492 = vmatprep.mubr.msk.bf16.mxu1 %vm3491_vm5, %v4445_v26  ;;  %vm689_vm5 = vcmp.eq.s32.totalorder %v4748_v25, %v510_v59  ;;  %4118 = vmatpush3.bf16.msra.mxu1 %v4331_v47  ;;  %v4337_v59 = vld [vmem:[%s5553_s3 + $0x200] sm:$0xff]  }
 0x13c   :  { %vm3503_vm7 = vmpackc.low %vm691_vm4, %vm689_vm5  ;;  %vm698_vm4 = vcmp.eq.s32.totalorder %v4739_v22, %v525_v0  ;;  %vm696_vm5 = vcmp.eq.s32.totalorder %v4739_v22, %v522_v1  ;;  %v531_v4 = vpop.permute.xlu1 %530  ;;  %4119 = vmatprep.subr.bf16.mxu1 %v4333_v24 }
 0x13d   :  { %vm3513_vm8 = vmpackc.low %vm698_vm4, %vm696_vm5  ;;  %v606_v42 = vpop.permute.xlu0 %605 }
 0x13f   :  { %4120 = vmatpush3.bf16.msra.mxu1 %v4333_v24 }
 0x140   :  { %v537_v6 = vpop.permute.xlu1 %536  ;;  %4121 = vmatprep.subr.bf16.mxu1 %v4335_v56 }
 0x141   :  { %v612_v44 = vpop.permute.xlu0 %611 }
 0x142   :  { %3494 = vmatmul.mubr.msk.bf16.gmra.mxu1 %vm3493_vm10, %v4445_v26  ;;  %vm695_vm10 = vcmp.eq.s32.totalorder %v4748_v25, %v519_v61 }
 0x143   :  { %3496 = vmatprep.mubr.msk.bf16.mxu1 %vm3495_vm11, %v4445_v26  ;;  %vm693_vm11 = vcmp.eq.s32.totalorder %v4748_v25, %v516_v62  ;;  %4122 = vmatpush3.bf16.msra.mxu1 %v4335_v56 }
 0x144   :  { %vm3507_vm13 = vmpackc.low %vm695_vm10, %vm693_vm11  ;;  %vm702_vm10 = vcmp.eq.s32.totalorder %v4739_v22, %v531_v4  ;;  %vm700_vm11 = vcmp.eq.s32.totalorder %v4739_v22, %v528_v5  ;;  %v543_v9 = vpop.permute.xlu1 %542  ;;  %4123 = vmatprep.subr.bf16.mxu1 %v4337_v59 }
 0x145   :  { %vm3517_vm14 = vmpackc.low %vm702_vm10, %vm700_vm11  ;;  %v618_v46 = vpop.permute.xlu0 %617 }
 0x147   :  { %4124 = vmatpush3.bf16.msra.mxu1 %v4337_v59  ;;  %v4317_v59 = vld [vmem:[%s5553_s3 + $0x90] sm:$0xff]  }
 0x148   :  { %v549_v12 = vpop.permute.xlu1 %548 }
 0x149   :  { %v624_v51 = vpop.permute.xlu0 %623 }
 0x14a   :  { %3498 = vmatmul.mubr.msk.bf16.gmra.mxu1 %vm3497_vm0, %v4445_v26  ;;  %vm699_vm0 = vcmp.eq.s32.totalorder %v4748_v25, %v525_v0  ;;  %v5014_v0 = vld [vmem:[%s5553_s3 + $0x2b8] sm:$0xff]  }
 0x14b   :  { %3500 = vmatprep.mubr.msk.bf16.mxu1 %vm3499_vm1, %v4445_v26  ;;  %vm697_vm1 = vcmp.eq.s32.totalorder %v4748_v25, %v522_v1  ;;  %4149 = vmatprep.subr.bf16.mxu1 %v5014_v0 }
 0x14c   :  { %vm3511_vm3 = vmpackc.low %vm699_vm0, %vm697_vm1  ;;  %vm706_vm0 = vcmp.eq.s32.totalorder %v4739_v22, %v537_v6  ;;  %vm704_vm1 = vcmp.eq.s32.totalorder %v4739_v22, %v534_v7  ;;  %v555_v15 = vpop.permute.xlu1 %554 }
 0x14d   :  { %vm3521_vm4 = vmpackc.low %vm706_vm0, %vm704_vm1  ;;  %v630_v53 = vpop.permute.xlu0 %629 }
 0x150   :  { %v561_v19 = vpop.permute.xlu1 %560 }
 0x151   :  { %v636_v61 = vpop.permute.xlu0 %635 }
 0x152   :  { %3502 = vmatmul.mubr.msk.bf16.gmra.mxu1 %vm3501_vm6, %v4445_v26  ;;  %vm703_vm6 = vcmp.eq.s32.totalorder %v4748_v25, %v531_v4 }
 0x153   :  { %3504 = vmatprep.mubr.msk.bf16.mxu1 %vm3503_vm7, %v4445_v26  ;;  %vm701_vm7 = vcmp.eq.s32.totalorder %v4748_v25, %v528_v5 }
 0x154   :  { %vm3515_vm9 = vmpackc.low %vm703_vm6, %vm701_vm7  ;;  %vm710_vm6 = vcmp.eq.s32.totalorder %v4739_v22, %v543_v9  ;;  %vm708_vm7 = vcmp.eq.s32.totalorder %v4739_v22, %v540_v10  ;;  %v567_v21 = vpop.permute.xlu1 %566 }
 0x155   :  { %vm3525_vm10 = vmpackc.low %vm710_vm6, %vm708_vm7  ;;  %v642_v5 = vpop.permute.xlu0 %641 }
 0x158   :  { %v573_v27 = vpop.permute.xlu1 %572 }
 0x15a   :  { %3506 = vmatmul.mubr.msk.bf16.gmra.mxu1 %vm3505_vm12, %v4445_v26  ;;  %vm707_vm12 = vcmp.eq.s32.totalorder %v4748_v25, %v537_v6 }
 0x15b   :  { %3508 = vmatprep.mubr.msk.bf16.mxu1 %vm3507_vm13, %v4445_v26  ;;  %vm705_vm13 = vcmp.eq.s32.totalorder %v4748_v25, %v534_v7 }
 0x15c   :  { %vm3519_vm15 = vmpackc.low %vm707_vm12, %vm705_vm13  ;;  %vm714_vm12 = vcmp.eq.s32.totalorder %v4739_v22, %v549_v12  ;;  %vm712_vm13 = vcmp.eq.s32.totalorder %v4739_v22, %v546_v13  ;;  %v579_v30 = vpop.permute.xlu1 %578 }
 0x15d   :  { %vm3529_vm0 = vmpackc.low %vm714_vm12, %vm712_vm13 }
 0x160   :  { %v585_v32 = vpop.permute.xlu1 %584 }
 0x162   :  { %3510 = vmatmul.mubr.msk.bf16.gmra.mxu1 %vm3509_vm2, %v4445_v26  ;;  %vm711_vm2 = vcmp.eq.s32.totalorder %v4748_v25, %v543_v9 }
 0x163   :  { %3512 = vmatprep.mubr.msk.bf16.mxu1 %vm3511_vm3, %v4445_v26  ;;  %vm709_vm3 = vcmp.eq.s32.totalorder %v4748_v25, %v540_v10 }
 0x164   :  { %vm3523_vm5 = vmpackc.low %vm711_vm2, %vm709_vm3  ;;  %vm718_vm2 = vcmp.eq.s32.totalorder %v4739_v22, %v555_v15  ;;  %vm716_vm3 = vcmp.eq.s32.totalorder %v4739_v22, %v552_v16  ;;  %v591_v34 = vpop.permute.xlu1 %590 }
 0x165   :  { %vm3533_vm6 = vmpackc.low %vm718_vm2, %vm716_vm3 }
 0x168   :  { %v597_v36 = vpop.permute.xlu1 %596 }
 0x16a   :  { %3514 = vmatmul.mubr.msk.bf16.gmra.mxu1 %vm3513_vm8, %v4445_v26  ;;  %vm715_vm8 = vcmp.eq.s32.totalorder %v4748_v25, %v549_v12  ;;  %v648_v12 = vpop.permute.xlu0 %647 }
 0x16b   :  { %3516 = vmatprep.mubr.msk.bf16.mxu1 %vm3515_vm9, %v4445_v26  ;;  %vm713_vm9 = vcmp.eq.s32.totalorder %v4748_v25, %v546_v13 }
 0x16c   :  { %vm3527_vm11 = vmpackc.low %vm715_vm8, %vm713_vm9  ;;  %vm722_vm8 = vcmp.eq.s32.totalorder %v4739_v22, %v561_v19  ;;  %vm720_vm9 = vcmp.eq.s32.totalorder %v4739_v22, %v558_v20  ;;  %v603_v38 = vpop.permute.xlu1 %602 }
 0x16d   :  { %vm3537_vm12 = vmpackc.low %vm722_vm8, %vm720_vm9 }
 0x170   :  { %v609_v41 = vpop.permute.xlu1 %608 }
 0x172   :  { %3518 = vmatmul.mubr.msk.bf16.gmra.mxu1 %vm3517_vm14, %v4445_v26  ;;  %vm719_vm14 = vcmp.eq.s32.totalorder %v4748_v25, %v555_v15 }
 0x173   :  { %3520 = vmatprep.mubr.msk.bf16.mxu1 %vm3519_vm15, %v4445_v26  ;;  %vm717_vm15 = vcmp.eq.s32.totalorder %v4748_v25, %v552_v16  ;;  %v4304_v16 = vld [vmem:[%s5553_s3 + $0x30] sm:$0xff]  }
 0x174   :  { %vm3531_vm1 = vmpackc.low %vm719_vm14, %vm717_vm15  ;;  %vm726_vm14 = vcmp.eq.s32.totalorder %v4739_v22, %v567_v21  ;;  %vm724_vm15 = vcmp.eq.s32.totalorder %v4739_v22, %v564_v23  ;;  %v615_v43 = vpop.permute.xlu1 %614 }
 0x175   :  { %vm3541_vm2 = vmpackc.low %vm726_vm14, %vm724_vm15 }
 0x178   :  { %v621_v45 = vpop.permute.xlu1 %620 }
 0x17a   :  { %3522 = vmatmul.mubr.msk.bf16.gmra.mxu1 %vm3521_vm4, %v4445_v26  ;;  %vm723_vm4 = vcmp.eq.s32.totalorder %v4748_v25, %v561_v19 }
 0x17b   :  { %3524 = vmatprep.mubr.msk.bf16.mxu1 %vm3523_vm5, %v4445_v26  ;;  %vm721_vm5 = vcmp.eq.s32.totalorder %v4748_v25, %v558_v20  ;;  %v4305_v20 = vld [vmem:[%s5553_s3 + $0x28] sm:$0xff]  }
 0x17c   :  { %vm3535_vm7 = vmpackc.low %vm723_vm4, %vm721_vm5  ;;  %vm730_vm4 = vcmp.eq.s32.totalorder %v4739_v22, %v573_v27  ;;  %vm728_vm5 = vcmp.eq.s32.totalorder %v4739_v22, %v570_v29  ;;  %v627_v50 = vpop.permute.xlu1 %626 }
 0x17d   :  { %vm3545_vm8 = vmpackc.low %vm730_vm4, %vm728_vm5 }
 0x180   :  { %v633_v52 = vpop.permute.xlu1 %632 }
 0x182   :  { %3526 = vmatmul.mubr.msk.bf16.gmra.mxu1 %vm3525_vm10, %v4445_v26  ;;  %vm727_vm10 = vcmp.eq.s32.totalorder %v4748_v25, %v567_v21 }
 0x183   :  { %3528 = vmatprep.mubr.msk.bf16.mxu1 %vm3527_vm11, %v4445_v26  ;;  %vm725_vm11 = vcmp.eq.s32.totalorder %v4748_v25, %v564_v23 }
 0x184   :  { %vm3539_vm13 = vmpackc.low %vm727_vm10, %vm725_vm11  ;;  %vm734_vm10 = vcmp.eq.s32.totalorder %v4739_v22, %v579_v30  ;;  %vm732_vm11 = vcmp.eq.s32.totalorder %v4739_v22, %v576_v28  ;;  %v639_v60 = vpop.permute.xlu1 %638 }
 0x185   :  { %vm3549_vm14 = vmpackc.low %vm734_vm10, %vm732_vm11 }
 0x188   :  { %v645_v4 = vpop.permute.xlu1 %644 }
 0x18a   :  { %3530 = vmatmul.mubr.msk.bf16.gmra.mxu1 %vm3529_vm0, %v4445_v26  ;;  %vm731_vm0 = vcmp.eq.s32.totalorder %v4748_v25, %v573_v27  ;;  %v654_v27 = vpop.permute.xlu0 %653 }
 0x18b   :  { %3532 = vmatprep.mubr.msk.bf16.mxu1 %vm3531_vm1, %v4445_v26  ;;  %vm729_vm1 = vcmp.eq.s32.totalorder %v4748_v25, %v570_v29  ;;  %v4306_v29 = vld [vmem:[%s5553_s3 + $0x20] sm:$0xff]  }
 0x18c   :  { %vm3543_vm3 = vmpackc.low %vm731_vm0, %vm729_vm1  ;;  %vm738_vm0 = vcmp.eq.s32.totalorder %v4739_v22, %v585_v32  ;;  %vm736_vm1 = vcmp.eq.s32.totalorder %v4739_v22, %v582_v33  ;;  %v651_v11 = vpop.permute.xlu1 %650 }
 0x18d   :  { %vm3553_vm4 = vmpackc.low %vm738_vm0, %vm736_vm1 }
 0x190   :  { %v657_v23 = vpop.permute.xlu1 %656 }
 0x192   :  { %3534 = vmatmul.mubr.msk.bf16.gmra.mxu1 %vm3533_vm6, %v4445_v26  ;;  %vm735_vm6 = vcmp.eq.s32.totalorder %v4748_v25, %v579_v30 }
 0x193   :  { %3536 = vmatprep.mubr.msk.bf16.mxu1 %vm3535_vm7, %v4445_v26  ;;  %vm733_vm7 = vcmp.eq.s32.totalorder %v4748_v25, %v576_v28 }
 0x194   :  { %vm3547_vm9 = vmpackc.low %vm735_vm6, %vm733_vm7  ;;  %vm742_vm6 = vcmp.eq.s32.totalorder %v4739_v22, %v591_v34  ;;  %vm740_vm7 = vcmp.eq.s32.totalorder %v4739_v22, %v588_v35  ;;  %v663_v31 = vpop.permute.xlu1 %662 }
 0x195   :  { %vm3557_vm10 = vmpackc.low %vm742_vm6, %vm740_vm7 }
 0x19a   :  { %3538 = vmatmul.mubr.msk.bf16.gmra.mxu1 %vm3537_vm12, %v4445_v26  ;;  %vm739_vm12 = vcmp.eq.s32.totalorder %v4748_v25, %v585_v32  ;;  %v4307_v32 = vld [vmem:[%s5553_s3 + $0x18] sm:$0xff]  }
 0x19b   :  { %3540 = vmatprep.mubr.msk.bf16.mxu1 %vm3539_vm13, %v4445_v26  ;;  %vm737_vm13 = vcmp.eq.s32.totalorder %v4748_v25, %v582_v33  ;;  %v660_v33 = vpop.permute.xlu0 %659 }
 0x19c   :  { %vm3551_vm15 = vmpackc.low %vm739_vm12, %vm737_vm13  ;;  %vm746_vm12 = vcmp.eq.s32.totalorder %v4739_v22, %v597_v36  ;;  %vm744_vm13 = vcmp.eq.s32.totalorder %v4739_v22, %v594_v37 }
 0x19d   :  { %vm3561_vm0 = vmpackc.low %vm746_vm12, %vm744_vm13 }
 0x1a2   :  { %3542 = vmatmul.mubr.msk.bf16.gmra.mxu1 %vm3541_vm2, %v4445_v26  ;;  %vm743_vm2 = vcmp.eq.s32.totalorder %v4748_v25, %v591_v34 }
 0x1a3   :  { %3544 = vmatprep.mubr.msk.bf16.mxu1 %vm3543_vm3, %v4445_v26  ;;  %vm741_vm3 = vcmp.eq.s32.totalorder %v4748_v25, %v588_v35 }
 0x1a4   :  { %vm3555_vm5 = vmpackc.low %vm743_vm2, %vm741_vm3  ;;  %vm750_vm2 = vcmp.eq.s32.totalorder %v4739_v22, %v603_v38  ;;  %vm748_vm3 = vcmp.eq.s32.totalorder %v4739_v22, %v600_v39 }
 0x1a5   :  { %vm3565_vm6 = vmpackc.low %vm750_vm2, %vm748_vm3 }
 0x1aa   :  { %3546 = vmatmul.mubr.msk.bf16.gmra.mxu1 %vm3545_vm8, %v4445_v26  ;;  %vm747_vm8 = vcmp.eq.s32.totalorder %v4748_v25, %v597_v36  ;;  %v4308_v36 = vld [vmem:[%s5553_s3 + $0x10] sm:$0xff]  }
 0x1ab   :  { %3548 = vmatprep.mubr.msk.bf16.mxu1 %vm3547_vm9, %v4445_v26  ;;  %vm745_vm9 = vcmp.eq.s32.totalorder %v4748_v25, %v594_v37 }
 0x1ac   :  { %vm3559_vm11 = vmpackc.low %vm747_vm8, %vm745_vm9  ;;  %vm754_vm8 = vcmp.eq.s32.totalorder %v4739_v22, %v609_v41  ;;  %vm752_vm9 = vcmp.eq.s32.totalorder %v4739_v22, %v606_v42 }
 0x1ad   :  { %vm3569_vm12 = vmpackc.low %vm754_vm8, %vm752_vm9 }
 0x1b2   :  { %3550 = vmatmul.mubr.msk.bf16.gmra.mxu1 %vm3549_vm14, %v4445_v26  ;;  %vm751_vm14 = vcmp.eq.s32.totalorder %v4748_v25, %v603_v38 }
 0x1b3   :  { %3552 = vmatprep.mubr.msk.bf16.mxu1 %vm3551_vm15, %v4445_v26  ;;  %vm749_vm15 = vcmp.eq.s32.totalorder %v4748_v25, %v600_v39 }
 0x1b4   :  { %vm3563_vm1 = vmpackc.low %vm751_vm14, %vm749_vm15  ;;  %vm758_vm14 = vcmp.eq.s32.totalorder %v4739_v22, %v615_v43  ;;  %vm756_vm15 = vcmp.eq.s32.totalorder %v4739_v22, %v612_v44 }
 0x1b5   :  { %vm3573_vm2 = vmpackc.low %vm758_vm14, %vm756_vm15 }
 0x1ba   :  { %3554 = vmatmul.mubr.msk.bf16.gmra.mxu1 %vm3553_vm4, %v4445_v26  ;;  %vm755_vm4 = vcmp.eq.s32.totalorder %v4748_v25, %v609_v41  ;;  %v4310_v41 = vld [vmem:[%s5553_s3] sm:$0xff]  }
 0x1bb   :  { %3556 = vmatprep.mubr.msk.bf16.mxu1 %vm3555_vm5, %v4445_v26  ;;  %vm753_vm5 = vcmp.eq.s32.totalorder %v4748_v25, %v606_v42 }
 0x1bc   :  { %vm3567_vm7 = vmpackc.low %vm755_vm4, %vm753_vm5  ;;  %vm762_vm4 = vcmp.eq.s32.totalorder %v4739_v22, %v621_v45  ;;  %vm760_vm5 = vcmp.eq.s32.totalorder %v4739_v22, %v618_v46 }
 0x1bd   :  { %vm3577_vm8 = vmpackc.low %vm762_vm4, %vm760_vm5 }
 0x1c2   :  { %3558 = vmatmul.mubr.msk.bf16.gmra.mxu1 %vm3557_vm10, %v4445_v26  ;;  %vm759_vm10 = vcmp.eq.s32.totalorder %v4748_v25, %v615_v43 }
 0x1c3   :  { %3560 = vmatprep.mubr.msk.bf16.mxu1 %vm3559_vm11, %v4445_v26  ;;  %vm757_vm11 = vcmp.eq.s32.totalorder %v4748_v25, %v612_v44 }
 0x1c4   :  { %vm3571_vm13 = vmpackc.low %vm759_vm10, %vm757_vm11  ;;  %vm766_vm10 = vcmp.eq.s32.totalorder %v4739_v22, %v627_v50  ;;  %vm764_vm11 = vcmp.eq.s32.totalorder %v4739_v22, %v624_v51 }
 0x1c5   :  { %vm3581_vm14 = vmpackc.low %vm766_vm10, %vm764_vm11 }
 0x1ca   :  { %3562 = vmatmul.mubr.msk.bf16.gmra.mxu1 %vm3561_vm0, %v4445_v26  ;;  %vm763_vm0 = vcmp.eq.s32.totalorder %v4748_v25, %v621_v45 }
 0x1cb   :  { %3564 = vmatprep.mubr.msk.bf16.mxu1 %vm3563_vm1, %v4445_v26  ;;  %vm761_vm1 = vcmp.eq.s32.totalorder %v4748_v25, %v618_v46 }
 0x1cc   :  { %vm3575_vm3 = vmpackc.low %vm763_vm0, %vm761_vm1  ;;  %vm770_vm0 = vcmp.eq.s32.totalorder %v4739_v22, %v633_v52  ;;  %vm768_vm1 = vcmp.eq.s32.totalorder %v4739_v22, %v630_v53 }
 0x1cd   :  { %vm3585_vm4 = vmpackc.low %vm770_vm0, %vm768_vm1 }
 0x1d2   :  { %3566 = vmatmul.mubr.msk.bf16.gmra.mxu1 %vm3565_vm6, %v4445_v26  ;;  %vm767_vm6 = vcmp.eq.s32.totalorder %v4748_v25, %v627_v50 }
 0x1d3   :  { %3568 = vmatprep.mubr.msk.bf16.mxu1 %vm3567_vm7, %v4445_v26  ;;  %vm765_vm7 = vcmp.eq.s32.totalorder %v4748_v25, %v624_v51 }
 0x1d4   :  { %vm3579_vm9 = vmpackc.low %vm767_vm6, %vm765_vm7  ;;  %vm774_vm6 = vcmp.eq.s32.totalorder %v4739_v22, %v639_v60  ;;  %vm772_vm7 = vcmp.eq.s32.totalorder %v4739_v22, %v636_v61 }
 0x1d5   :  { %vm3589_vm10 = vmpackc.low %vm774_vm6, %vm772_vm7 }
 0x1da   :  { %3570 = vmatmul.mubr.msk.bf16.gmra.mxu1 %vm3569_vm12, %v4445_v26  ;;  %vm771_vm12 = vcmp.eq.s32.totalorder %v4748_v25, %v633_v52  ;;  %v4315_v52 = vld [vmem:[%s5553_s3 + $0xa0] sm:$0xff]  }
 0x1db   :  { %3572 = vmatprep.mubr.msk.bf16.mxu1 %vm3571_vm13, %v4445_v26  ;;  %vm769_vm13 = vcmp.eq.s32.totalorder %v4748_v25, %v630_v53 }
 0x1dc   :  { %vm3583_vm15 = vmpackc.low %vm771_vm12, %vm769_vm13  ;;  %vm778_vm12 = vcmp.eq.s32.totalorder %v4739_v22, %v645_v4  ;;  %vm776_vm13 = vcmp.eq.s32.totalorder %v4739_v22, %v642_v5 }
 0x1dd   :  { %vm3593_vm0 = vmpackc.low %vm778_vm12, %vm776_vm13 }
 0x1e2   :  { %3574 = vmatmul.mubr.msk.bf16.gmra.mxu1 %vm3573_vm2, %v4445_v26  ;;  %vm775_vm2 = vcmp.eq.s32.totalorder %v4748_v25, %v639_v60 }
 0x1e3   :  { %3576 = vmatprep.mubr.msk.bf16.mxu1 %vm3575_vm3, %v4445_v26  ;;  %vm773_vm3 = vcmp.eq.s32.totalorder %v4748_v25, %v636_v61 }
 0x1e4   :  { %vm3587_vm5 = vmpackc.low %vm775_vm2, %vm773_vm3  ;;  %vm782_vm2 = vcmp.eq.s32.totalorder %v4739_v22, %v651_v11  ;;  %vm780_vm3 = vcmp.eq.s32.totalorder %v4739_v22, %v648_v12 }
 0x1e5   :  { %vm3597_vm6 = vmpackc.low %vm782_vm2, %vm780_vm3 }
 0x1ea   :  { %v4982_v49 = vpop.f32.mrf.mxu1  ;;  %3578 = vmatmul.mubr.msk.bf16.gmra.mxu1 %vm3577_vm8, %v4445_v26  ;;  %vm779_vm8 = vcmp.eq.s32.totalorder %v4748_v25, %v645_v4  ;;  %v4319_v4 = vld [vmem:[%s5553_s3 + $0x80] sm:$0xff]  }
 0x1eb   :  { %3580 = vmatprep.mubr.msk.bf16.mxu1 %vm3579_vm9, %v4445_v26  ;;  %vm777_vm9 = vcmp.eq.s32.totalorder %v4748_v25, %v642_v5 }
 0x1ec   :  { %v1148_v3 = vpop.f32.mrf.mxu1  ;;  %vm3591_vm11 = vmpackc.low %vm779_vm8, %vm777_vm9  ;;  %vm786_vm8 = vcmp.eq.s32.totalorder %v4739_v22, %v657_v23  ;;  %vm784_vm9 = vcmp.eq.s32.totalorder %v4739_v22, %v654_v27 }
 0x1ed   :  { %vm3601_vm12 = vmpackc.low %vm786_vm8, %vm784_vm9 }
 0x1ee   :  { %v4991_v54 = vpop.f32.mrf.mxu1 }
 0x1ef   :  { %v1401_v18 = vpack.c.bf16 %v4991_v54, %v4982_v49  ;;  %v4314_v49 = vld [vmem:[%s5553_s3 + $0xa8] sm:$0xff]  }
 0x1f0   :  { %v1151_v55 = vpop.f32.mrf.mxu1 }
 0x1f1   :  { %v4316_v55 = vld [vmem:[%s5553_s3 + $0x98] sm:$0xff]  }
 0x1f2   :  { %v4998_v57 = vpop.f32.mrf.mxu1  ;;  %3582 = vmatmul.mubr.msk.bf16.gmra.mxu1 %vm3581_vm14, %v4445_v26  ;;  %vm783_vm14 = vcmp.eq.s32.totalorder %v4748_v25, %v651_v11 }
 0x1f3   :  { %3584 = vmatprep.mubr.msk.bf16.mxu1 %vm3583_vm15, %v4445_v26  ;;  %vm781_vm15 = vcmp.eq.s32.totalorder %v4748_v25, %v648_v12  ;;  %v4322_v12 = vld [vmem:[%s5553_s3 + $0xf0] sm:$0xff]  }
 0x1f4   :  { %v1156_v58 = vpop.f32.mrf.mxu1  ;;  %vm3595_vm1 = vmpackc.low %vm783_vm14, %vm781_vm15  ;;  %vm790_vm14 = vcmp.eq.s32.totalorder %v4739_v22, %v663_v31  ;;  %vm788_vm15 = vcmp.eq.s32.totalorder %v4739_v22, %v660_v33  ;;  %v4312_v22 = vld [vmem:[%s5553_s3 + $0xb8] sm:$0xff]  }
 0x1f6   :  { %v5007_v62 = vpop.f32.mrf.mxu1 }
 0x1f7   :  { %v1402_v46 = vpack.c.bf16 %v5007_v62, %v4998_v57  ;;  %v4318_v62 = vld [vmem:[%s5553_s3 + $0x88] sm:$0xff]  }
 0x1f8   :  { %v1159_v63 = vpop.f32.mrf.mxu1 }
 0x1fa   :  { %v1162_v1 = vpop.f32.mrf.mxu1  ;;  %3586 = vmatmul.mubr.msk.bf16.gmra.mxu1 %vm3585_vm4, %v4445_v26  ;;  %vm787_vm4 = vcmp.eq.s32.totalorder %v4748_v25, %v657_v23 }
 0x1fb   :  { %3588 = vmatprep.mubr.msk.bf16.mxu1 %vm3587_vm5, %v4445_v26  ;;  %vm785_vm5 = vcmp.eq.s32.totalorder %v4748_v25, %v654_v27 }
 0x1fc   :  { %v1164_v2 = vpop.f32.mrf.mxu1  ;;  %vm3599_vm7 = vmpackc.low %vm787_vm4, %vm785_vm5 }
 0x1fe   :  { %v1165_v6 = vpop.f32.mrf.mxu1 }
 0x1ff   :  { %v1403_v7 = vpack.c.bf16 %v1165_v6, %v1162_v1 }
 0x200   :  { %v1167_v8 = vpop.f32.mrf.mxu1 }
 0x201   :  { %3965 = vmatprep.mubr.bf16.mxu0 %v1403_v7  ;;  %v4321_v7 = vld [vmem:[%s5553_s3 + $0xf8] sm:$0xff]  }
 0x202   :  { %v1170_v9 = vpop.f32.mrf.mxu1  ;;  %3590 = vmatmul.mubr.msk.bf16.gmra.mxu1 %vm3589_vm10, %v4445_v26  ;;  %vm791_vm10 = vcmp.eq.s32.totalorder %v4748_v25, %v663_v31  ;;  %v4326_v31 = vld [vmem:[%s5553_s3 + $0xd0] sm:$0xff]  }
 0x203   :  { %3592 = vmatprep.mubr.msk.bf16.mxu1 %vm3591_vm11, %v4445_v26  ;;  %vm789_vm11 = vcmp.eq.s32.totalorder %v4748_v25, %v660_v33  ;;  %v4309_v25 = vld [vmem:[%s5553_s3 + $0x8] sm:$0xff]  }
 0x204   :  { %v1172_v10 = vpop.f32.mrf.mxu1  ;;  %vm3603_vm13 = vmpackc.low %vm791_vm10, %vm789_vm11 }
 0x206   :  { %v1173_v13 = vpop.f32.mrf.mxu1 }
 0x207   :  { %v1404_v14 = vpack.c.bf16 %v1173_v13, %v1170_v9 }
 0x208   :  { %v1175_v15 = vpop.f32.mrf.mxu1 }
 0x209   :  { %3966 = vmatmul.mubr.bf16.vlgmr.msra.gmra.mxu0 %v1404_v14 }
 0x20a   :  { %3970 = vmatpush3.bf16.msra.mxu0 %v4890_v17  ;;  %v5035_v19 = vpop.f32.mrf.mxu1  ;;  %3594 = vmatmul.mubr.msk.bf16.gmra.mxu1 %vm3593_vm0, %v4445_v26  ;;  %vm3605_vm0 = vmpackc.low %vm790_vm14, %vm788_vm15 }
 0x20b   :  { %3985 = vmatprep.mubr.bf16.mxu0 %v1401_v18  ;;  %3596 = vmatprep.mubr.msk.bf16.mxu1 %vm3595_vm1, %v4445_v26 }
 0x20c   :  { %v1180_v21 = vpop.f32.mrf.mxu1  ;;  %3971 = vmatprep.subr.bf16.mxu0 %v4304_v16 }
 0x20d   :  { %v4324_v21 = vld [vmem:[%s5553_s3 + $0xe0] sm:$0xff]  }
 0x20e   :  { %3972 = vmatpush3.bf16.msra.mxu0 %v4304_v16  ;;  %v1181_v17 = vpop.f32.mrf.mxu1  ;;  %v4323_v16 = vld [vmem:[%s5553_s3 + $0xe8] sm:$0xff]  }
 0x20f   :  { %3973 = vmatprep.subr.bf16.mxu0 %v4305_v20  ;;  %v1405_v50 = vpack.c.bf16 %v1181_v17, %v5035_v19  ;;  %v4325_v17 = vld [vmem:[%s5553_s3 + $0xd8] sm:$0xff]  }
 0x210   :  { %v1183_v30 = vpop.f32.mrf.mxu1 }
 0x212   :  { %3974 = vmatpush3.bf16.msra.mxu0 %v4305_v20  ;;  %v5049_v28 = vpop.f32.mrf.mxu1  ;;  %3598 = vmatmul.mubr.msk.bf16.gmra.mxu1 %vm3597_vm6, %v4445_v26 }
 0x213   :  { %3600 = vmatprep.mubr.msk.bf16.mxu1 %vm3599_vm7, %v4445_v26  ;;  %3975 = vmatprep.subr.bf16.mxu0 %v4306_v29 }
 0x214   :  { %v1188_v34 = vpop.f32.mrf.mxu1 }
 0x215   :  { %v4327_v34 = vld [vmem:[%s5553_s3 + $0xc8] sm:$0xff]  }
 0x216   :  { %3976 = vmatpush3.bf16.msra.mxu0 %v4306_v29  ;;  %v5058_v35 = vpop.f32.mrf.mxu1 }
 0x217   :  { %3977 = vmatprep.subr.bf16.mxu0 %v4307_v32  ;;  %v1406_v10 = vpack.c.bf16 %v5058_v35, %v5049_v28 }
 0x218   :  { %v1191_v37 = vpop.f32.mrf.mxu1 }
 0x21a   :  { %3978 = vmatpush3.bf16.msra.mxu0 %v4307_v32  ;;  %v5065_v38 = vpop.f32.mrf.mxu1  ;;  %3602 = vmatmul.mubr.msk.bf16.gmra.mxu1 %vm3601_vm12, %v4445_v26 }
 0x21b   :  { %3604 = vmatprep.mubr.msk.bf16.mxu1 %vm3603_vm13, %v4445_v26  ;;  %3979 = vmatprep.subr.bf16.mxu0 %v4308_v36 }
 0x21c   :  { %v1196_v39 = vpop.f32.mrf.mxu1 }
 0x21e   :  { %3980 = vmatpush3.bf16.msra.mxu0 %v4308_v36  ;;  %v5074_v40 = vpop.f32.mrf.mxu1 }
 0x21f   :  { %3981 = vmatprep.subr.bf16.mxu0 %v4309_v25  ;;  %v1407_v13 = vpack.c.bf16 %v5074_v40, %v5065_v38  ;;  %v4328_v38 = vld [vmem:[%s5553_s3 + $0xc0] sm:$0xff]   ;;  %v4330_v40 = vld [vmem:[%s5553_s3 + $0x138] sm:$0xff]  }
 0x220   :  { %v1199_v42 = vpop.f32.mrf.mxu1 }
 0x222   :  { %3982 = vmatpush3.bf16.msra.mxu0 %v4309_v25  ;;  %v5079_v43 = vpop.f32.mrf.mxu1  ;;  %3606 = vmatmul.mubr.msk.bf16.gmra.mxu1 %vm3605_vm0, %v4445_v26  ;;  %v4313_v26 = vld [vmem:[%s5553_s3 + $0xb0] sm:$0xff]  }
 0x223   :  { %3983 = vmatprep.subr.bf16.mxu0 %v4310_v41 }
 0x224   :  { %v1204_v44 = vpop.f32.mrf.mxu1 }
 0x225   :  { %v4332_v44 = vld [vmem:[%s5553_s3 + $0x130] sm:$0xff]  }
 0x226   :  { %3984 = vmatpush3.bf16.msra.mxu0 %v4310_v41  ;;  %v5085_v45 = vpop.f32.mrf.mxu1 }
 0x227   :  { %v1408_v48 = vpack.c.bf16 %v5085_v45, %v5079_v43  ;;  %3989 = vmatprep.subr.bf16.mxu0 %v4312_v22  ;;  %v4338_v45 = vld [vmem:[%s5553_s3 + $0x118] sm:$0xff]  }
 0x228   :  { %v1207_v51 = vpop.f32.mrf.mxu1 }
 0x229   :  { %3986 = vmatmul.mubr.bf16.vlgmr.msra.gmra.mxu0 %v1402_v46  ;;  %v4334_v51 = vld [vmem:[%s5553_s3 + $0x128] sm:$0xff]  }
 0x22a   :  { %3990 = vmatpush3.bf16.msra.mxu0 %v4312_v22  ;;  %4005 = vmatprep.mubr.bf16.mxu0 %v1405_v50  ;;  %v5095_v47 = vpop.f32.mrf.mxu1 }
 0x22b   :  { %3991 = vmatprep.subr.bf16.mxu0 %v4313_v26 }
 0x22c   :  { %v1212_v3 = vpop.f32.mrf.mxu1 }
 0x22e   :  { %3992 = vmatpush3.bf16.msra.mxu0 %v4313_v26  ;;  %v5100_v24 = vpop.f32.mrf.mxu1 }
 0x22f   :  { %3993 = vmatprep.subr.bf16.mxu0 %v4314_v49  ;;  %v1409_v46 = vpack.c.bf16 %v5100_v24, %v5095_v47  ;;  %v4336_v47 = vld [vmem:[%s5553_s3 + $0x120] sm:$0xff]  }
 0x230   :  { %v1215_v53 = vpop.f32.mrf.mxu1 }
 0x232   :  { %3994 = vmatpush3.bf16.msra.mxu0 %v4314_v49  ;;  %v5105_v54 = vpop.f32.mrf.mxu1 }
 0x233   :  { %3995 = vmatprep.subr.bf16.mxu0 %v4315_v52 }
 0x234   :  { %v1220_v56 = vpop.f32.mrf.mxu1 }
 0x235   :  { %v4340_v56 = vld [vmem:[%s5553_s3 + $0x110] sm:$0xff]  }
 0x236   :  { %3996 = vmatpush3.bf16.msra.mxu0 %v4315_v52  ;;  %v5110_v57 = vpop.f32.mrf.mxu1 }
 0x237   :  { %v1410_v58 = vpack.c.bf16 %v5110_v57, %v5105_v54  ;;  %3997 = vmatprep.subr.bf16.mxu0 %v4316_v55 }
 0x238   :  { %v1223_v60 = vpop.f32.mrf.mxu1 }
 0x23a   :  { %3998 = vmatpush3.bf16.msra.mxu0 %v4316_v55  ;;  %v5117_v61 = vpop.f32.mrf.mxu1 }
 0x23b   :  { %3999 = vmatprep.subr.bf16.mxu0 %v4317_v59 }
 0x23c   :  { %v1228_v63 = vpop.f32.mrf.mxu1 }
 0x23d   :  { %v4342_v63 = vld [vmem:[%s5553_s3 + $0x108] sm:$0xff]  }
 0x23e   :  { %4000 = vmatpush3.bf16.msra.mxu0 %v4317_v59  ;;  %v5122_v1 = vpop.f32.mrf.mxu1  ;;  %v4341_v59 = vld [vmem:[%s5553_s3 + $0x2b0] sm:$0xff]  }
 0x23f   :  { %v1411_v2 = vpack.c.bf16 %v5122_v1, %v5117_v61  ;;  %4001 = vmatprep.subr.bf16.mxu0 %v4318_v62  ;;  %v4353_v1 = vld [vmem:[%s5553_s3 + $0x280] sm:$0xff]  }
 0x240   :  { %v1231_v5 = vpop.f32.mrf.mxu1 }
 0x242   :  { %4002 = vmatpush3.bf16.msra.mxu0 %v4318_v62  ;;  %v5129_v6 = vpop.f32.mrf.mxu1 }
 0x243   :  { %4003 = vmatprep.subr.bf16.mxu0 %v4319_v4 }
 0x244   :  { %v1236_v8 = vpop.f32.mrf.mxu1 }
 0x246   :  { %4004 = vmatpush3.bf16.msra.mxu0 %v4319_v4  ;;  %v5134_v9 = vpop.f32.mrf.mxu1  ;;  %v4343_v4 = vld [vmem:[%s5553_s3 + $0x2a8] sm:$0xff]  }
 0x247   :  { %v1412_v11 = vpack.c.bf16 %v5134_v9, %v5129_v6  ;;  %4009 = vmatprep.subr.bf16.mxu0 %v4321_v7 }
 0x248   :  { %v1239_v14 = vpop.f32.mrf.mxu1 }
 0x249   :  { %4006 = vmatmul.mubr.bf16.vlgmr.msra.gmra.mxu0 %v1406_v10  ;;  %v4345_v10 = vld [vmem:[%s5553_s3 + $0x2a0] sm:$0xff]   ;;  %v4346_v14 = vld [vmem:[%s5553_s3 + $0x178] sm:$0xff]  }
 0x24a   :  { %4010 = vmatpush3.bf16.msra.mxu0 %v4321_v7  ;;  %4025 = vmatprep.mubr.bf16.mxu0 %v1407_v13  ;;  %v5145_v15 = vpop.f32.mrf.mxu1 }
 0x24b   :  { %4011 = vmatprep.subr.bf16.mxu0 %v4322_v12 }
 0x24c   :  { %v1244_v18 = vpop.f32.mrf.mxu1 }
 0x24e   :  { %4012 = vmatpush3.bf16.msra.mxu0 %v4322_v12  ;;  %v5150_v19 = vpop.f32.mrf.mxu1 }
 0x24f   :  { %v1413_v20 = vpack.c.bf16 %v5150_v19, %v5145_v15  ;;  %4013 = vmatprep.subr.bf16.mxu0 %v4323_v16  ;;  %v4369_v19 = vld [vmem:[%s5553_s3 + $0x300] sm:$0xff]  }
 0x250   :  { %v1247_v23 = vpop.f32.mrf.mxu1 }
 0x252   :  { %4014 = vmatpush3.bf16.msra.mxu0 %v4323_v16  ;;  %v5157_v27 = vpop.f32.mrf.mxu1  ;;  %v4347_v16 = vld [vmem:[%s5553_s3 + $0x298] sm:$0xff]  }
 0x253   :  { %4015 = vmatprep.subr.bf16.mxu0 %v4324_v21 }
 0x254   :  { %v1252_v29 = vpop.f32.mrf.mxu1 }
 0x256   :  { %4016 = vmatpush3.bf16.msra.mxu0 %v4324_v21  ;;  %v5162_v30 = vpop.f32.mrf.mxu1 }
 0x257   :  { %v1414_v28 = vpack.c.bf16 %v5162_v30, %v5157_v27  ;;  %4017 = vmatprep.subr.bf16.mxu0 %v4325_v17 }
 0x258   :  { %v1255_v32 = vpop.f32.mrf.mxu1 }
 0x25a   :  { %4018 = vmatpush3.bf16.msra.mxu0 %v4325_v17  ;;  %v5169_v33 = vpop.f32.mrf.mxu1  ;;  %v4348_v17 = vld [vmem:[%s5553_s3 + $0x170] sm:$0xff]  }
 0x25b   :  { %4019 = vmatprep.subr.bf16.mxu0 %v4326_v31 }
 0x25c   :  { %v1260_v35 = vpop.f32.mrf.mxu1 }
 0x25e   :  { %4020 = vmatpush3.bf16.msra.mxu0 %v4326_v31  ;;  %v5174_v36 = vpop.f32.mrf.mxu1  ;;  %v4349_v31 = vld [vmem:[%s5553_s3 + $0x290] sm:$0xff]  }
 0x25f   :  { %v1415_v37 = vpack.c.bf16 %v5174_v36, %v5169_v33  ;;  %4021 = vmatprep.subr.bf16.mxu0 %v4327_v34  ;;  %v4385_v36 = vld [vmem:[%s5553_s3 + $0x380] sm:$0xff]  }
 0x260   :  { %v1263_v25 = vpop.f32.mrf.mxu1 }
 0x261   :  { %v4354_v25 = vld [vmem:[%s5553_s3 + $0x158] sm:$0xff]  }
 0x262   :  { %4022 = vmatpush3.bf16.msra.mxu0 %v4327_v34  ;;  %v5181_v39 = vpop.f32.mrf.mxu1  ;;  %v4350_v34 = vld [vmem:[%s5553_s3 + $0x168] sm:$0xff]  }
 0x263   :  { %4023 = vmatprep.subr.bf16.mxu0 %v4328_v38 }
 0x264   :  { %v1268_v41 = vpop.f32.mrf.mxu1 }
 0x265   :  { %v4355_v41 = vld [vmem:[%s5553_s3 + $0x338] sm:$0xff]  }
 0x266   :  { %4024 = vmatpush3.bf16.msra.mxu0 %v4328_v38  ;;  %v5186_v42 = vpop.f32.mrf.mxu1  ;;  %v4351_v38 = vld [vmem:[%s5553_s3 + $0x288] sm:$0xff]  }
 0x267   :  { %v1416_v22 = vpack.c.bf16 %v5186_v42, %v5181_v39  ;;  %4029 = vmatprep.subr.bf16.mxu0 %v4330_v40  ;;  %v4394_v39 = vld [vmem:[%s5553_s3 + $0x258] sm:$0xff]   ;;  %v4395_v42 = vld [vmem:[%s5553_s3 + $0x250] sm:$0xff]  }
 0x268   :  { %v1271_v26 = vpop.f32.mrf.mxu1 }
 0x269   :  { %4026 = vmatmul.mubr.bf16.vlgmr.msra.gmra.mxu0 %v1408_v48  ;;  %v4356_v26 = vld [vmem:[%s5553_s3 + $0x150] sm:$0xff]  }
 0x26a   :  { %4030 = vmatpush3.bf16.msra.mxu0 %v4330_v40  ;;  %4045 = vmatprep.mubr.bf16.mxu0 %v1409_v46  ;;  %v1274_v50 = vpop.f32.mrf.mxu1 }
 0x26b   :  { %4031 = vmatprep.subr.bf16.mxu0 %v4332_v44 }
 0x26c   :  { %v1276_v49 = vpop.f32.mrf.mxu1 }
 0x26e   :  { %4032 = vmatpush3.bf16.msra.mxu0 %v4332_v44  ;;  %v1277_v3 = vpop.f32.mrf.mxu1 }
 0x26f   :  { %v1417_v52 = vpack.c.bf16 %v1277_v3, %v1274_v50  ;;  %4033 = vmatprep.subr.bf16.mxu0 %v4334_v51  ;;  %v4358_v3 = vld [vmem:[%s5553_s3 + $0x148] sm:$0xff]  }
 0x270   :  { %v1279_v24 = vpop.f32.mrf.mxu1 }
 0x271   :  { %4125 = vmatprep.mubr.bf16.mxu1 %v1417_v52 }
 0x272   :  { %4034 = vmatpush3.bf16.msra.mxu0 %v4334_v51  ;;  %v1282_v43 = vpop.f32.mrf.mxu1  ;;  %v4357_v51 = vld [vmem:[%s5553_s3 + $0x330] sm:$0xff]  }
 0x273   :  { %4035 = vmatprep.subr.bf16.mxu0 %v4336_v47 }
 0x274   :  { %v1284_v48 = vpop.f32.mrf.mxu1 }
 0x276   :  { %4036 = vmatpush3.bf16.msra.mxu0 %v4336_v47  ;;  %v1285_v53 = vpop.f32.mrf.mxu1  ;;  %v4359_v47 = vld [vmem:[%s5553_s3 + $0x328] sm:$0xff]  }
 0x277   :  { %v1418_v55 = vpack.c.bf16 %v1285_v53, %v1282_v43  ;;  %4037 = vmatprep.subr.bf16.mxu0 %v4338_v45  ;;  %v4361_v53 = vld [vmem:[%s5553_s3 + $0x320] sm:$0xff]  }
 0x278   :  { %v1287_v60 = vpop.f32.mrf.mxu1 }
 0x279   :  { %4126 = vmatmul.mubr.bf16.vlgmr.msra.gmra.mxu1 %v1418_v55  ;;  %v4363_v60 = vld [vmem:[%s5553_s3 + $0x318] sm:$0xff]  }
 0x27a   :  { %4038 = vmatpush3.bf16.msra.mxu0 %v4338_v45  ;;  %v5213_v62 = vpop.f32.mrf.mxu1  ;;  %4150 = vmatpush3.bf16.msra.mxu1 %v5014_v0  ;;  %v4344_v0 = vld [vmem:[%s5553_s3 + $0x100] sm:$0xff]  }
 0x27b   :  { %4039 = vmatprep.subr.bf16.mxu0 %v4340_v56  ;;  %4151 = vmatprep.subr.bf16.mxu1 %v4341_v59  ;;  %v4360_v45 = vld [vmem:[%s5553_s3 + $0x140] sm:$0xff]  }
 0x27c   :  { %v1292_v5 = vpop.f32.mrf.mxu1 }
 0x27d   :  { %v4364_v5 = vld [vmem:[%s5553_s3 + $0x1b0] sm:$0xff]  }
 0x27e   :  { %4040 = vmatpush3.bf16.msra.mxu0 %v4340_v56  ;;  %v5222_v7 = vpop.f32.mrf.mxu1  ;;  %4152 = vmatpush3.bf16.msra.mxu1 %v4341_v59  ;;  %v4362_v56 = vld [vmem:[%s5553_s3 + $0x1b8] sm:$0xff]  }
 0x27f   :  { %v1419_v8 = vpack.c.bf16 %v5222_v7, %v5213_v62  ;;  %4041 = vmatprep.subr.bf16.mxu0 %v4342_v63  ;;  %4153 = vmatprep.subr.bf16.mxu1 %v4343_v4  ;;  %v4397_v62 = vld [vmem:[%s5553_s3 + $0x240] sm:$0xff]   ;;  %v4398_v7 = vld [vmem:[%s5553_s3 + $0x2f8] sm:$0xff]  }
 0x280   :  { %v1295_v12 = vpop.f32.mrf.mxu1 }
 0x282   :  { %4042 = vmatpush3.bf16.msra.mxu0 %v4342_v63  ;;  %v5232_v13 = vpop.f32.mrf.mxu1  ;;  %4154 = vmatpush3.bf16.msra.mxu1 %v4343_v4 }
 0x283   :  { %4043 = vmatprep.subr.bf16.mxu0 %v4344_v0  ;;  %4155 = vmatprep.subr.bf16.mxu1 %v4345_v10 }
 0x284   :  { %v1300_v18 = vpop.f32.mrf.mxu1 }
 0x285   :  { %v4367_v18 = vld [vmem:[%s5553_s3 + $0x308] sm:$0xff]  }
 0x286   :  { %4044 = vmatpush3.bf16.msra.mxu0 %v4344_v0  ;;  %v5240_v21 = vpop.f32.mrf.mxu1  ;;  %4156 = vmatpush3.bf16.msra.mxu1 %v4345_v10  ;;  %v4365_v10 = vld [vmem:[%s5553_s3 + $0x310] sm:$0xff]  }
 0x287   :  { %v1420_v23 = vpack.c.bf16 %v5240_v21, %v5232_v13  ;;  %4049 = vmatprep.subr.bf16.mxu0 %v4346_v14  ;;  %4157 = vmatprep.subr.bf16.mxu1 %v4347_v16  ;;  %v4402_v13 = vld [vmem:[%s5553_s3 + $0x2d8] sm:$0xff]   ;;  %v4403_v21 = vld [vmem:[%s5553_s3 + $0x2d0] sm:$0xff]  }
 0x288   :  { %v1303_v29 = vpop.f32.mrf.mxu1 }
 0x289   :  { %4046 = vmatmul.mubr.bf16.vlgmr.msra.gmra.mxu0 %v1410_v58  ;;  %v4352_v58 = vld [vmem:[%s5553_s3 + $0x160] sm:$0xff]  }
 0x28a   :  { %4050 = vmatpush3.bf16.msra.mxu0 %v4346_v14  ;;  %4065 = vmatprep.mubr.bf16.mxu0 %v1411_v2  ;;  %v1306_v32 = vpop.f32.mrf.mxu1  ;;  %v4366_v14 = vld [vmem:[%s5553_s3 + $0x1a8] sm:$0xff]  }
 0x28b   :  { %4158 = vmatpush3.bf16.msra.mxu1 %v4347_v16  ;;  %4051 = vmatprep.subr.bf16.mxu0 %v4348_v17 }
 0x28c   :  { %v1308_v35 = vpop.f32.mrf.mxu1  ;;  %4159 = vmatprep.subr.bf16.mxu1 %v4349_v31 }
 0x28d   :  { %v4372_v35 = vld [vmem:[%s5553_s3 + $0x190] sm:$0xff]  }
 0x28e   :  { %4052 = vmatpush3.bf16.msra.mxu0 %v4348_v17  ;;  %v1309_v54 = vpop.f32.mrf.mxu1  ;;  %v4370_v17 = vld [vmem:[%s5553_s3 + $0x198] sm:$0xff]  }
 0x28f   :  { %v1421_v57 = vpack.c.bf16 %v1309_v54, %v1306_v32  ;;  %4160 = vmatpush3.bf16.msra.mxu1 %v4349_v31  ;;  %4053 = vmatprep.subr.bf16.mxu0 %v4350_v34  ;;  %v4371_v31 = vld [vmem:[%s5553_s3 + $0x3b8] sm:$0xff]   ;;  %v4373_v54 = vld [vmem:[%s5553_s3 + $0x3b0] sm:$0xff]  }
 0x290   :  { %v1311_v61 = vpop.f32.mrf.mxu1  ;;  %4161 = vmatprep.subr.bf16.mxu1 %v4351_v38 }
 0x291   :  { %4165 = vmatprep.mubr.bf16.mxu1 %v1421_v57 }
 0x292   :  { %4054 = vmatpush3.bf16.msra.mxu0 %v4350_v34  ;;  %v1314_v2 = vpop.f32.mrf.mxu1 }
 0x293   :  { %4162 = vmatpush3.bf16.msra.mxu1 %v4351_v38  ;;  %4055 = vmatprep.subr.bf16.mxu0 %v4352_v58 }
 0x294   :  { %v1316_v40 = vpop.f32.mrf.mxu1  ;;  %4163 = vmatprep.subr.bf16.mxu1 %v4353_v1 }
 0x295   :  { %v4376_v40 = vld [vmem:[%s5553_s3 + $0x180] sm:$0xff]  }
 0x296   :  { %4056 = vmatpush3.bf16.msra.mxu0 %v4352_v58  ;;  %v1317_v44 = vpop.f32.mrf.mxu1  ;;  %v4374_v58 = vld [vmem:[%s5553_s3 + $0x188] sm:$0xff]  }
 0x297   :  { %v1422_v46 = vpack.c.bf16 %v1317_v44, %v1314_v2  ;;  %4164 = vmatpush3.bf16.msra.mxu1 %v4353_v1  ;;  %4057 = vmatprep.subr.bf16.mxu0 %v4354_v25  ;;  %v4375_v1 = vld [vmem:[%s5553_s3 + $0x3a8] sm:$0xff]   ;;  %v4377_v44 = vld [vmem:[%s5553_s3 + $0x3a0] sm:$0xff]  }
 0x298   :  { %v1319_v50 = vpop.f32.mrf.mxu1  ;;  %4189 = vmatprep.subr.bf16.mxu1 %v4355_v41 }
 0x29a   :  { %4058 = vmatpush3.bf16.msra.mxu0 %v4354_v25  ;;  %4166 = vmatmul.mubr.bf16.vlgmr.msra.gmra.mxu1 %v1422_v46  ;;  %v5280_v49 = vpop.f32.mrf.mxu1 }
 0x29b   :  { %4190 = vmatpush3.bf16.msra.mxu1 %v4355_v41  ;;  %4059 = vmatprep.subr.bf16.mxu0 %v4356_v26 }
 0x29c   :  { %v1324_v52 = vpop.f32.mrf.mxu1  ;;  %4191 = vmatprep.subr.bf16.mxu1 %v4357_v51 }
 0x29e   :  { %4060 = vmatpush3.bf16.msra.mxu0 %v4356_v26  ;;  %v5288_v24 = vpop.f32.mrf.mxu1  ;;  %v4378_v26 = vld [vmem:[%s5553_s3 + $0x1f8] sm:$0xff]  }
 0x29f   :  { %v1423_v43 = vpack.c.bf16 %v5288_v24, %v5280_v49  ;;  %4192 = vmatpush3.bf16.msra.mxu1 %v4357_v51  ;;  %4061 = vmatprep.subr.bf16.mxu0 %v4358_v3  ;;  %v4379_v51 = vld [vmem:[%s5553_s3 + $0x398] sm:$0xff]   ;;  %v4405_v49 = vld [vmem:[%s5553_s3 + $0x2c0] sm:$0xff]  }
 0x2a0   :  { %v1327_v48 = vpop.f32.mrf.mxu1  ;;  %4193 = vmatprep.subr.bf16.mxu1 %v4359_v47  ;;  %v4406_v24 = vld [vmem:[%s5553_s3 + $0x378] sm:$0xff]  }
 0x2a1   :  { %v4381_v48 = vld [vmem:[%s5553_s3 + $0x390] sm:$0xff]  }
 0x2a2   :  { %4062 = vmatpush3.bf16.msra.mxu0 %v4358_v3  ;;  %v5298_v55 = vpop.f32.mrf.mxu1 }
 0x2a3   :  { %4194 = vmatpush3.bf16.msra.mxu1 %v4359_v47  ;;  %4063 = vmatprep.subr.bf16.mxu0 %v4360_v45  ;;  %v4380_v47 = vld [vmem:[%s5553_s3 + $0x1f0] sm:$0xff]  }
 0x2a4   :  { %v1332_v59 = vpop.f32.mrf.mxu1  ;;  %4195 = vmatprep.subr.bf16.mxu1 %v4361_v53 }
 0x2a6   :  { %4064 = vmatpush3.bf16.msra.mxu0 %v4360_v45  ;;  %v5306_v63 = vpop.f32.mrf.mxu1 }
 0x2a7   :  { %v1424_v4 = vpack.c.bf16 %v5306_v63, %v5298_v55  ;;  %4196 = vmatpush3.bf16.msra.mxu1 %v4361_v53  ;;  %4069 = vmatprep.subr.bf16.mxu0 %v4362_v56  ;;  %v4410_v55 = vld [vmem:[%s5553_s3 + $0x358] sm:$0xff]   ;;  %v4411_v63 = vld [vmem:[%s5553_s3 + $0x350] sm:$0xff]  }
 0x2a8   :  { %v1335_v0 = vpop.f32.mrf.mxu1  ;;  %4197 = vmatprep.subr.bf16.mxu1 %v4363_v60 }
 0x2a9   :  { %4066 = vmatmul.mubr.bf16.vlgmr.msra.gmra.mxu0 %v1412_v11  ;;  %v4368_v11 = vld [vmem:[%s5553_s3 + $0x1a0] sm:$0xff]  }
 0x2aa   :  { %4070 = vmatpush3.bf16.msra.mxu0 %v4362_v56  ;;  %4085 = vmatprep.mubr.bf16.mxu0 %v1413_v20  ;;  %v1338_v12 = vpop.f32.mrf.mxu1  ;;  %v4382_v56 = vld [vmem:[%s5553_s3 + $0x1e8] sm:$0xff]  }
 0x2ab   :  { %4198 = vmatpush3.bf16.msra.mxu1 %v4363_v60  ;;  %4071 = vmatprep.subr.bf16.mxu0 %v4364_v5  ;;  %v4383_v60 = vld [vmem:[%s5553_s3 + $0x388] sm:$0xff]  }
 0x2ac   :  { %v1340_v16 = vpop.f32.mrf.mxu1  ;;  %4199 = vmatprep.subr.bf16.mxu1 %v4365_v10 }
 0x2ae   :  { %4072 = vmatpush3.bf16.msra.mxu0 %v4364_v5  ;;  %v1341_v6 = vpop.f32.mrf.mxu1  ;;  %v4386_v5 = vld [vmem:[%s5553_s3 + $0x1d8] sm:$0xff]  }
 0x2af   :  { %v1425_v9 = vpack.c.bf16 %v1341_v6, %v1338_v12  ;;  %4200 = vmatpush3.bf16.msra.mxu1 %v4365_v10  ;;  %4073 = vmatprep.subr.bf16.mxu0 %v4366_v14  ;;  %v4388_v6 = vld [vmem:[%s5553_s3 + $0x1c8] sm:$0xff]  }
 0x2b0   :  { %v1343_v15 = vpop.f32.mrf.mxu1  ;;  %4201 = vmatprep.subr.bf16.mxu1 %v4367_v18 }
 0x2b1   :  { %4205 = vmatprep.mubr.bf16.mxu1 %v1425_v9 }
 0x2b2   :  { %4074 = vmatpush3.bf16.msra.mxu0 %v4366_v14  ;;  %v1346_v20 = vpop.f32.mrf.mxu1  ;;  %v4387_v14 = vld [vmem:[%s5553_s3 + $0x1d0] sm:$0xff]  }
 0x2b3   :  { %4202 = vmatpush3.bf16.msra.mxu1 %v4367_v18  ;;  %4075 = vmatprep.subr.bf16.mxu0 %v4368_v11 }
 0x2b4   :  { %v1348_v29 = vpop.f32.mrf.mxu1  ;;  %4203 = vmatprep.subr.bf16.mxu1 %v4369_v19 }
 0x2b5   :  { %v4390_v29 = vld [vmem:[%s5553_s3 + $0x278] sm:$0xff]  }
 0x2b6   :  { %4076 = vmatpush3.bf16.msra.mxu0 %v4368_v11  ;;  %v1349_v32 = vpop.f32.mrf.mxu1 }
 0x2b7   :  { %v1426_v34 = vpack.c.bf16 %v1349_v32, %v1346_v20  ;;  %4204 = vmatpush3.bf16.msra.mxu1 %v4369_v19  ;;  %4077 = vmatprep.subr.bf16.mxu0 %v4370_v17  ;;  %v4389_v19 = vld [vmem:[%s5553_s3 + $0x1c0] sm:$0xff]  }
 0x2b8   :  { %v1351_v38 = vpop.f32.mrf.mxu1  ;;  %4229 = vmatprep.subr.bf16.mxu1 %v4371_v31 }
 0x2ba   :  { %4078 = vmatpush3.bf16.msra.mxu0 %v4370_v17  ;;  %4206 = vmatmul.mubr.bf16.vlgmr.msra.gmra.mxu1 %v1426_v34  ;;  %v5346_v57 = vpop.f32.mrf.mxu1 }
 0x2bb   :  { %4230 = vmatpush3.bf16.msra.mxu1 %v4371_v31  ;;  %4079 = vmatprep.subr.bf16.mxu0 %v4372_v35 }
 0x2bc   :  { %v1356_v61 = vpop.f32.mrf.mxu1  ;;  %4231 = vmatprep.subr.bf16.mxu1 %v4373_v54 }
 0x2bd   :  { %v4400_v61 = vld [vmem:[%s5553_s3 + $0x2e8] sm:$0xff]  }
 0x2be   :  { %4080 = vmatpush3.bf16.msra.mxu0 %v4372_v35  ;;  %v5354_v2 = vpop.f32.mrf.mxu1  ;;  %v4391_v35 = vld [vmem:[%s5553_s3 + $0x270] sm:$0xff]  }
 0x2bf   :  { %v1427_v25 = vpack.c.bf16 %v5354_v2, %v5346_v57  ;;  %4232 = vmatpush3.bf16.msra.mxu1 %v4373_v54  ;;  %4081 = vmatprep.subr.bf16.mxu0 %v4374_v58  ;;  %v4392_v54 = vld [vmem:[%s5553_s3 + $0x268] sm:$0xff]   ;;  %v4413_v57 = vld [vmem:[%s5553_s3 + $0x340] sm:$0xff]   ;;  %v4414_v2 = vld [vmem:[%s5553_s3 + $0x3f8] sm:$0xff]  }
 0x2c0   :  { %v1359_v41 = vpop.f32.mrf.mxu1  ;;  %4233 = vmatprep.subr.bf16.mxu1 %v4375_v1 }
 0x2c1   :  { %v4409_v41 = vld [vmem:[%s5553_s3 + $0x360] sm:$0xff]  }
 0x2c2   :  { %4082 = vmatpush3.bf16.msra.mxu0 %v4374_v58  ;;  %v5364_v46 = vpop.f32.mrf.mxu1  ;;  %v4393_v58 = vld [vmem:[%s5553_s3 + $0x260] sm:$0xff]  }
 0x2c3   :  { %4234 = vmatpush3.bf16.msra.mxu1 %v4375_v1  ;;  %4083 = vmatprep.subr.bf16.mxu0 %v4376_v40  ;;  %v4401_v1 = vld [vmem:[%s5553_s3 + $0x2e0] sm:$0xff]  }
 0x2c4   :  { %v1364_v50 = vpop.f32.mrf.mxu1  ;;  %4235 = vmatprep.subr.bf16.mxu1 %v4377_v44 }
 0x2c5   :  { %v4419_v50 = vld [vmem:[%s5553_s3 + $0x3d0] sm:$0xff]  }
 0x2c6   :  { %4084 = vmatpush3.bf16.msra.mxu0 %v4376_v40  ;;  %v5372_v3 = vpop.f32.mrf.mxu1  ;;  %v4408_v40 = vld [vmem:[%s5553_s3 + $0x368] sm:$0xff]  }
 0x2c7   :  { %v1428_v52 = vpack.c.bf16 %v5372_v3, %v5364_v46  ;;  %4236 = vmatpush3.bf16.msra.mxu1 %v4377_v44  ;;  %4089 = vmatprep.subr.bf16.mxu0 %v4378_v26  ;;  %v4416_v44 = vld [vmem:[%s5553_s3 + $0x3e8] sm:$0xff]   ;;  %v4418_v46 = vld [vmem:[%s5553_s3 + $0x3d8] sm:$0xff]   ;;  %v4421_v3 = vld [vmem:[%s5553_s3 + $0x3c0] sm:$0xff]  }
 0x2c8   :  { %v1367_v45 = vpop.f32.mrf.mxu1  ;;  %4237 = vmatprep.subr.bf16.mxu1 %v4379_v51 }
 0x2c9   :  { %4086 = vmatmul.mubr.bf16.vlgmr.msra.gmra.mxu0 %v1414_v28  ;;  %v4384_v28 = vld [vmem:[%s5553_s3 + $0x1e0] sm:$0xff]  }
 0x2ca   :  { %4090 = vmatpush3.bf16.msra.mxu0 %v4378_v26  ;;  %4105 = vmatprep.mubr.bf16.mxu0 %v1415_v37  ;;  %v1370_v53 = vpop.f32.mrf.mxu1  ;;  %v4417_v26 = vld [vmem:[%s5553_s3 + $0x3e0] sm:$0xff]  }
 0x2cb   :  { %4238 = vmatpush3.bf16.msra.mxu1 %v4379_v51  ;;  %4091 = vmatprep.subr.bf16.mxu0 %v4380_v47  ;;  %v4420_v51 = vld [vmem:[%s5553_s3 + $0x3c8] sm:$0xff]  }
 0x2cc   :  { %v1372_v59 = vpop.f32.mrf.mxu1  ;;  %4239 = vmatprep.subr.bf16.mxu1 %v4381_v48 }
 0x2ce   :  { %4092 = vmatpush3.bf16.msra.mxu0 %v4380_v47  ;;  %v1373_v27 = vpop.f32.mrf.mxu1 }
 0x2cf   :  { %v1429_v30 = vpack.c.bf16 %v1373_v27, %v1370_v53  ;;  %4240 = vmatpush3.bf16.msra.mxu1 %v4381_v48  ;;  %4093 = vmatprep.subr.bf16.mxu0 %v4382_v56 }
 0x2d0   :  { %v1375_v33 = vpop.f32.mrf.mxu1  ;;  %4241 = vmatprep.subr.bf16.mxu1 %v4383_v60 }
 0x2d1   :  { %4245 = vmatprep.mubr.bf16.mxu1 %v1429_v30 }
 0x2d2   :  { %4094 = vmatpush3.bf16.msra.mxu0 %v4382_v56  ;;  %v1378_v37 = vpop.f32.mrf.mxu1 }
 0x2d3   :  { %4242 = vmatpush3.bf16.msra.mxu1 %v4383_v60  ;;  %4095 = vmatprep.subr.bf16.mxu0 %v4384_v28 }
 0x2d4   :  { %v1380_v0 = vpop.f32.mrf.mxu1  ;;  %4243 = vmatprep.subr.bf16.mxu1 %v4385_v36 }
 0x2d6   :  { %4096 = vmatpush3.bf16.msra.mxu0 %v4384_v28  ;;  %v1381_v10 = vpop.f32.mrf.mxu1 }
 0x2d7   :  { %v1430_v12 = vpack.c.bf16 %v1381_v10, %v1378_v37  ;;  %4244 = vmatpush3.bf16.msra.mxu1 %v4385_v36  ;;  %4097 = vmatprep.subr.bf16.mxu0 %v4386_v5 }
 0x2d8   :  { %v1383_v16 = vpop.f32.mrf.mxu1 }
 0x2da   :  { %4098 = vmatpush3.bf16.msra.mxu0 %v4386_v5  ;;  %4246 = vmatmul.mubr.bf16.vlgmr.msra.gmra.mxu1 %v1430_v12  ;;  %v5406_v18 = vpop.f32.mrf.mxu1 }
 0x2db   :  { %4099 = vmatprep.subr.bf16.mxu0 %v4387_v14 }
 0x2dc   :  { %v1388_v9 = vpop.f32.mrf.mxu1 }
 0x2de   :  { %4100 = vmatpush3.bf16.msra.mxu0 %v4387_v14  ;;  %v5411_v11 = vpop.f32.mrf.mxu1 }
 0x2df   :  { %v1431_v15 = vpack.c.bf16 %v5411_v11, %v5406_v18  ;;  %4101 = vmatprep.subr.bf16.mxu0 %v4388_v6 }
 0x2e0   :  { %v1391_v20 = vpop.f32.mrf.mxu1 }
 0x2e2   :  { %4102 = vmatpush3.bf16.msra.mxu0 %v4388_v6  ;;  %v5418_v17 = vpop.f32.mrf.mxu1 }
 0x2e3   :  { %4103 = vmatprep.subr.bf16.mxu0 %v4389_v19 }
 0x2e4   :  { %v1396_v31 = vpop.f32.mrf.mxu1 }
 0x2e6   :  { %4104 = vmatpush3.bf16.msra.mxu0 %v4389_v19  ;;  %v5423_v32 = vpop.f32.mrf.mxu1 }
 0x2e7   :  { %v1432_v34 = vpack.c.bf16 %v5423_v32, %v5418_v17  ;;  %4129 = vmatprep.subr.bf16.mxu0 %v4390_v29 }
 0x2e8   :  { %v1399_v38 = vpop.f32.mrf.mxu1 }
 0x2e9   :  { %4106 = vmatmul.mubr.bf16.vlgmr.msra.gmra.mxu0 %v1416_v22  ;;  %v4396_v22 = vld [vmem:[%s5553_s3 + $0x248] sm:$0xff]  }
 0x2ea   :  { %4130 = vmatpush3.bf16.msra.mxu0 %v4390_v29  ;;  %4145 = vmatprep.mubr.bf16.mxu0 %v1419_v8  ;;  %v4399_v8 = vld [vmem:[%s5553_s3 + $0x2f0] sm:$0xff]  }
 0x2eb   :  { %4131 = vmatprep.subr.bf16.mxu0 %v4391_v35 }
 0x2ee   :  { %4132 = vmatpush3.bf16.msra.mxu0 %v4391_v35 }
 0x2ef   :  { %4133 = vmatprep.subr.bf16.mxu0 %v4392_v54 }
 0x2f2   :  { %4134 = vmatpush3.bf16.msra.mxu0 %v4392_v54 }
 0x2f3   :  { %4135 = vmatprep.subr.bf16.mxu0 %v4393_v58 }
 0x2f6   :  { %4136 = vmatpush3.bf16.msra.mxu0 %v4393_v58 }
 0x2f7   :  { %4137 = vmatprep.subr.bf16.mxu0 %v4394_v39 }
 0x2fa   :  { %4138 = vmatpush3.bf16.msra.mxu0 %v4394_v39 }
 0x2fb   :  { %4139 = vmatprep.subr.bf16.mxu0 %v4395_v42 }
 0x2fe   :  { %4140 = vmatpush3.bf16.msra.mxu0 %v4395_v42 }
 0x2ff   :  { %4141 = vmatprep.subr.bf16.mxu0 %v4396_v22 }
 0x302   :  { %4142 = vmatpush3.bf16.msra.mxu0 %v4396_v22 }
 0x303   :  { %4143 = vmatprep.subr.bf16.mxu0 %v4397_v62 }
 0x306   :  { %4144 = vmatpush3.bf16.msra.mxu0 %v4397_v62 }
 0x307   :  { %4169 = vmatprep.subr.bf16.mxu0 %v4398_v7 }
 0x309   :  { %4146 = vmatmul.mubr.bf16.vlgmr.msra.gmra.mxu0 %v1420_v23  ;;  %v4404_v23 = vld [vmem:[%s5553_s3 + $0x2c8] sm:$0xff]  }
 0x30a   :  { %4170 = vmatpush3.bf16.msra.mxu0 %v4398_v7  ;;  %4185 = vmatprep.mubr.bf16.mxu0 %v1423_v43  ;;  %v4407_v43 = vld [vmem:[%s5553_s3 + $0x370] sm:$0xff]  }
 0x30b   :  { %4171 = vmatprep.subr.bf16.mxu0 %v4399_v8 }
 0x30e   :  { %4172 = vmatpush3.bf16.msra.mxu0 %v4399_v8 }
 0x30f   :  { %4173 = vmatprep.subr.bf16.mxu0 %v4400_v61 }
 0x312   :  { %4174 = vmatpush3.bf16.msra.mxu0 %v4400_v61 }
 0x313   :  { %4175 = vmatprep.subr.bf16.mxu0 %v4401_v1 }
 0x316   :  { %4176 = vmatpush3.bf16.msra.mxu0 %v4401_v1 }
 0x317   :  { %4177 = vmatprep.subr.bf16.mxu0 %v4402_v13 }
 0x31a   :  { %4178 = vmatpush3.bf16.msra.mxu0 %v4402_v13 }
 0x31b   :  { %4179 = vmatprep.subr.bf16.mxu0 %v4403_v21 }
 0x31e   :  { %4180 = vmatpush3.bf16.msra.mxu0 %v4403_v21 }
 0x31f   :  { %4181 = vmatprep.subr.bf16.mxu0 %v4404_v23 }
 0x322   :  { %4182 = vmatpush3.bf16.msra.mxu0 %v4404_v23 }
 0x323   :  { %4183 = vmatprep.subr.bf16.mxu0 %v4405_v49 }
 0x326   :  { %4184 = vmatpush3.bf16.msra.mxu0 %v4405_v49 }
 0x327   :  { %4209 = vmatprep.subr.bf16.mxu0 %v4406_v24 }
 0x329   :  { %4186 = vmatmul.mubr.bf16.vlgmr.msra.gmra.mxu0 %v1424_v4  ;;  %v4412_v4 = vld [vmem:[%s5553_s3 + $0x348] sm:$0xff]  }
 0x32a   :  { %4210 = vmatpush3.bf16.msra.mxu0 %v4406_v24  ;;  %4225 = vmatprep.mubr.bf16.mxu0 %v1427_v25  ;;  %v4415_v25 = vld [vmem:[%s5553_s3 + $0x3f0] sm:$0xff]   ;;  %s4446_s3 = smov [#allocation2]  }
 0x32b   :  { %4211 = vmatprep.subr.bf16.mxu0 %v4407_v43  ;;  %s3306_s9 = sshll.u32 %s4446_s3, 4  ;;  %s3307_s9 = int_to_ptr.vmem [resolvable:$true] %s3306_s9 }
 0x32c   :  { %s4422_s10 = scalar_lea.vmem %s3307_s9, 512  ;;  %p4427_p1 = scmp.lt.s32.totalorder %s3307_s9, %s3307_s9 }
 0x32d   :  { %p4423_p0 = scmp.ne.s32.totalorder %s3307_s9, %s4422_s10  ;;  %p4428_p2 = scmp.lt.s32.totalorder %s4422_s10, %s4422_s10 }
 0x32e   :  { %4212 = vmatpush3.bf16.msra.mxu0 %v4407_v43 }
 0x32f   :  { %4213 = vmatprep.subr.bf16.mxu0 %v4408_v40  ;;  %p4429_p3 = por %p4428_p2, %p4427_p1 }
 0x331   :  { %p4430_p4 = pnand %p4429_p3, %p4423_p0 }
 0x332   :  { %4214 = vmatpush3.bf16.msra.mxu0 %v4408_v40 }
 0x333   :  { %4215 = vmatprep.subr.bf16.mxu0 %v4409_v41 }
 0x336   :  { %4216 = vmatpush3.bf16.msra.mxu0 %v4409_v41 }
 0x337   :  { %4217 = vmatprep.subr.bf16.mxu0 %v4410_v55 }
 0x339   :  { %v4127_v32 = vpop.f32.mrf.mxu1 }
 0x33a   :  { %4218 = vmatpush3.bf16.msra.mxu0 %v4410_v55 }
 0x33b   :  { %4219 = vmatprep.subr.bf16.mxu0 %v4411_v63  ;;  %v2459_v35 = vpop.f32.mrf.mxu1 }
 0x33d   :  { %v4128_v54 = vpop.f32.mrf.mxu1 }
 0x33e   :  { %4220 = vmatpush3.bf16.msra.mxu0 %v4411_v63 }
 0x33f   :  { %4221 = vmatprep.subr.bf16.mxu0 %v4412_v4  ;;  %v2462_v39 = vpop.f32.mrf.mxu1 }
 0x342   :  { %4222 = vmatpush3.bf16.msra.mxu0 %v4412_v4 }
 0x343   :  { %4223 = vmatprep.subr.bf16.mxu0 %v4413_v57 }
 0x346   :  { %4224 = vmatpush3.bf16.msra.mxu0 %v4413_v57 }
 0x347   :  { %4249 = vmatprep.subr.bf16.mxu0 %v4414_v2 }
 0x349   :  { %4226 = vmatmul.mubr.bf16.vlgmr.msra.gmra.mxu0 %v1428_v52  ;;  %v3967_v52 = vpop.f32.mrf.mxu0 }
 0x34a   :  { %4250 = vmatpush3.bf16.msra.mxu0 %v4414_v2  ;;  %4265 = vmatprep.mubr.bf16.mxu0 %v1431_v15 }
 0x34b   :  { %4251 = vmatprep.subr.bf16.mxu0 %v4415_v25  ;;  %v1547_v47 = vpop.f32.mrf.mxu0 }
 0x34d   :  { %v3968_v45 = vpop.f32.mrf.mxu0 }
 0x34e   :  { %4252 = vmatpush3.bf16.msra.mxu0 %v4415_v25 }
 0x34f   :  { %4253 = vmatprep.subr.bf16.mxu0 %v4416_v44  ;;  %v1550_v48 = vpop.f32.mrf.mxu0 }
 0x351   :  { %v3987_v53 = vpop.f32.mrf.mxu0 }
 0x352   :  { %4254 = vmatpush3.bf16.msra.mxu0 %v4416_v44  ;;  %v1653_v62 = vadd.f32 %v3987_v53, %v3967_v52 }
 0x353   :  { %4255 = vmatprep.subr.bf16.mxu0 %v4417_v26  ;;  %v1644_v56 = vpop.f32.mrf.mxu0 }
 0x354   :  { %v1645_v8 = vadd.f32 %v1644_v56, %v1547_v47 }
 0x355   :  { %v3988_v59 = vpop.f32.mrf.mxu0 }
 0x356   :  { %4256 = vmatpush3.bf16.msra.mxu0 %v4417_v26  ;;  %v1656_v13 = vadd.f32 %v3988_v59, %v3968_v45 }
 0x357   :  { %4257 = vmatprep.subr.bf16.mxu0 %v4418_v46  ;;  %v1647_v60 = vpop.f32.mrf.mxu0 }
 0x358   :  { %v1648_v24 = vadd.f32 %v1647_v60, %v1550_v48 }
 0x359   :  { %v4007_v27 = vpop.f32.mrf.mxu0 }
 0x35a   :  { %4258 = vmatpush3.bf16.msra.mxu0 %v4418_v46  ;;  %v4167_v22 = vpop.f32.mrf.mxu1  ;;  %v1774_v61 = vadd.f32 %v4007_v27, %v1653_v62 }
 0x35b   :  { %4259 = vmatprep.subr.bf16.mxu0 %v4419_v50  ;;  %v1757_v30 = vpop.f32.mrf.mxu0 }
 0x35c   :  { %v2693_v1 = vpop.f32.mrf.mxu1  ;;  %v1772_v21 = vadd.f32 %v1757_v30, %v1645_v8 }
 0x35d   :  { %v4008_v28 = vpop.f32.mrf.mxu0 }
 0x35e   :  { %4260 = vmatpush3.bf16.msra.mxu0 %v4419_v50  ;;  %v1775_v43 = vadd.f32 %v4008_v28, %v1656_v13  ;;  %v4168_v55 = vpop.f32.mrf.mxu1 }
 0x35f   :  { %4261 = vmatprep.subr.bf16.mxu0 %v4420_v51  ;;  %v1760_v33 = vpop.f32.mrf.mxu0 }
 0x360   :  { %v1773_v4 = vadd.f32 %v1760_v33, %v1648_v24 }
 0x361   :  { %v4027_v36 = vpop.f32.mrf.mxu0 }
 0x362   :  { %4262 = vmatpush3.bf16.msra.mxu0 %v4420_v51  ;;  %v1891_v23 = vadd.f32 %v4027_v36, %v1774_v61  ;;  %v2696_v51 = vpop.f32.mrf.mxu1 }
 0x363   :  { %4263 = vmatprep.subr.bf16.mxu0 %v4421_v3  ;;  %v1874_v37 = vpop.f32.mrf.mxu0 }
 0x364   :  { %v1889_v40 = vadd.f32 %v1874_v37, %v1772_v21 }
 0x365   :  { %v4028_v5 = vpop.f32.mrf.mxu0 }
 0x366   :  { %4264 = vmatpush3.bf16.msra.mxu0 %v4421_v3  ;;  %v1892_v57 = vadd.f32 %v4028_v5, %v1775_v43 }
 0x367   :  { %v1877_v0 = vpop.f32.mrf.mxu0 }
 0x368   :  { %v1890_v44 = vadd.f32 %v1877_v0, %v1773_v4 }
 0x369   :  { %4266 = vmatmul.mubr.bf16.vlgmr.msra.gmra.mxu0 %v1432_v34  ;;  %v4047_v10 = vpop.f32.mrf.mxu0 }
 0x36a   :  { %v2008_v41 = vadd.f32 %v4047_v10, %v1891_v23 }
 0x36b   :  { %v1991_v12 = vpop.f32.mrf.mxu0 }
 0x36c   :  { %v2006_v2 = vadd.f32 %v1991_v12, %v1889_v40 }
 0x36d   :  { %v4048_v14 = vpop.f32.mrf.mxu0 }
 0x36e   :  { %v2009_v26 = vadd.f32 %v4048_v14, %v1892_v57 }
 0x36f   :  { %v1994_v16 = vpop.f32.mrf.mxu0 }
 0x370   :  { %v2007_v52 = vadd.f32 %v1994_v16, %v1890_v44 }
 0x371   :  { %v4067_v18 = vpop.f32.mrf.mxu0 }
 0x372   :  { %v2125_v25 = vadd.f32 %v4067_v18, %v2008_v41 }
 0x373   :  { %v2108_v6 = vpop.f32.mrf.mxu0 }
 0x374   :  { %v2123_v46 = vadd.f32 %v2108_v6, %v2006_v2 }
 0x375   :  { %v4068_v9 = vpop.f32.mrf.mxu0 }
 0x376   :  { %v2126_v47 = vadd.f32 %v4068_v9, %v2009_v26 }
 0x377   :  { %v2111_v11 = vpop.f32.mrf.mxu0 }
 0x378   :  { %v2124_v56 = vadd.f32 %v2111_v11, %v2007_v52 }
 0x37a   :  { %v4207_v48 = vpop.f32.mrf.mxu1 }
 0x37c   :  { %v2927_v36 = vpop.f32.mrf.mxu1 }
 0x37e   :  { %v4208_v18 = vpop.f32.mrf.mxu1 }
 0x389   :  { %v4087_v15 = vpop.f32.mrf.mxu0 }
 0x38a   :  { %v2242_v50 = vadd.f32 %v4087_v15, %v2125_v25 }
 0x38b   :  { %v2225_v19 = vpop.f32.mrf.mxu0 }
 0x38c   :  { %v2240_v45 = vadd.f32 %v2225_v19, %v2123_v46 }
 0x38d   :  { %v4088_v20 = vpop.f32.mrf.mxu0 }
 0x38e   :  { %v2243_v59 = vadd.f32 %v4088_v20, %v2126_v47 }
 0x38f   :  { %v2228_v17 = vpop.f32.mrf.mxu0 }
 0x390   :  { %v2241_v30 = vadd.f32 %v2228_v17, %v2124_v56 }
 0x3a9   :  { %v4107_v29 = vpop.f32.mrf.mxu0 }
 0x3aa   :  { %v2359_v53 = vadd.f32 %v4107_v29, %v2242_v50  ;;  %v2930_v29 = vpop.f32.mrf.mxu1 }
 0x3ab   :  { %v2342_v31 = vpop.f32.mrf.mxu0 }
 0x3ac   :  { %v2357_v60 = vadd.f32 %v2342_v31, %v2240_v45  ;;  %v2476_v33 = vadd.f32 %v4127_v32, %v2359_v53  ;;  %v4247_v32 = vpop.f32.mrf.mxu1 }
 0x3ad   :  { %v4108_v34 = vpop.f32.mrf.mxu0 }
 0x3ae   :  { %v2360_v28 = vadd.f32 %v4108_v34, %v2243_v59  ;;  %v2474_v0 = vadd.f32 %v2459_v35, %v2357_v60  ;;  %v3161_v61 = vpop.f32.mrf.mxu1 }
 0x3af   :  { %v2345_v38 = vpop.f32.mrf.mxu0 }
 0x3b0   :  { %v2358_v37 = vadd.f32 %v2345_v38, %v2241_v30  ;;  %v2477_v14 = vadd.f32 %v4128_v54, %v2360_v28 }
 0x3b2   :  { %v2475_v9 = vadd.f32 %v2462_v39, %v2358_v37 }
 0x3c9   :  { %v4147_v58 = vpop.f32.mrf.mxu0 }
 0x3ca   :  { %v2593_v5 = vadd.f32 %v4147_v58, %v2476_v33 }
 0x3cb   :  { %v2576_v42 = vpop.f32.mrf.mxu0 }
 0x3cc   :  { %v2591_v12 = vadd.f32 %v2576_v42, %v2474_v0  ;;  %v2710_v15 = vadd.f32 %v4167_v22, %v2593_v5 }
 0x3cd   :  { %v4148_v7 = vpop.f32.mrf.mxu0 }
 0x3ce   :  { %v2594_v6 = vadd.f32 %v4148_v7, %v2477_v14  ;;  %v2708_v20 = vadd.f32 %v2693_v1, %v2591_v12  ;;  %v4248_v1 = vpop.f32.mrf.mxu1 }
 0x3cf   :  { %v2579_v49 = vpop.f32.mrf.mxu0 }
 0x3d0   :  { %v2592_v19 = vadd.f32 %v2579_v49, %v2475_v9  ;;  %v2711_v34 = vadd.f32 %v4168_v55, %v2594_v6  ;;  %v3164_v4 = vpop.f32.mrf.mxu1 }
 0x3d2   :  { %v2709_v38 = vadd.f32 %v2696_v51, %v2592_v19 }
 0x3e9   :  { %v4187_v63 = vpop.f32.mrf.mxu0 }
 0x3ea   :  { %v2827_v11 = vadd.f32 %v4187_v63, %v2710_v15 }
 0x3eb   :  { %v2810_v3 = vpop.f32.mrf.mxu0 }
 0x3ec   :  { %v2825_v17 = vadd.f32 %v2810_v3, %v2708_v20  ;;  %v2944_v58 = vadd.f32 %v4207_v48, %v2827_v11 }
 0x3ed   :  { %v4188_v27 = vpop.f32.mrf.mxu0 }
 0x3ee   :  { %v2828_v62 = vadd.f32 %v4188_v27, %v2711_v34  ;;  %v2942_v54 = vadd.f32 %v2927_v36, %v2825_v17 }
 0x3ef   :  { %v2813_v10 = vpop.f32.mrf.mxu0 }
 0x3f0   :  { %v2826_v8 = vadd.f32 %v2813_v10, %v2709_v38  ;;  %v2945_v7 = vadd.f32 %v4208_v18, %v2828_v62 }
 0x3f2   :  { %v2943_v21 = vadd.f32 %v2930_v29, %v2826_v8 }
 0x409   :  { %v4227_v16 = vpop.f32.mrf.mxu0 }
 0x40a   :  { %v3061_v42 = vadd.f32 %v4227_v16, %v2944_v58 }
 0x40b   :  { %v3044_v31 = vpop.f32.mrf.mxu0 }
 0x40c   :  { %v3059_v13 = vadd.f32 %v3044_v31, %v2942_v54  ;;  %v3178_v23 = vadd.f32 %v4247_v32, %v3061_v42 }
 0x40d   :  { %v4228_v35 = vpop.f32.mrf.mxu0 }
 0x40e   :  { %v3062_v22 = vadd.f32 %v4228_v35, %v2945_v7  ;;  %v3176_v40 = vadd.f32 %v3161_v61, %v3059_v13 }
 0x40f   :  { %v3047_v39 = vpop.f32.mrf.mxu0 }
 0x410   :  { %v3060_v24 = vadd.f32 %v3047_v39, %v2943_v21  ;;  %v3179_v63 = vadd.f32 %v4248_v1, %v3062_v22 }
 0x412   :  { %v3177_v25 = vadd.f32 %v3164_v4, %v3060_v24 }
 0x429   :  { %v4267_v49 = vpop.f32.mrf.mxu0 }
 0x42a   :  { %v3295_v43 = vadd.f32 %v4267_v49, %v3178_v23 }
 0x42b   :  { %v3278_v41 = vpop.f32.mrf.mxu0 }
 0x42c   :  { %3299 = vst [vmem:[#allocation2 + $0x10] sm:$0xff] %v3295_v43  ;;  %v3293_v55 = vadd.f32 %v3278_v41, %v3176_v40 }
 0x42d   :  { %v4268_v57 = vpop.f32.mrf.mxu0 }
 0x42e   :  { %3297 = vst [vmem:[#allocation2] sm:$0xff] %v3293_v55  ;;  %v3296_v2 = vadd.f32 %v4268_v57, %v3179_v63 }
 0x42f   :  { %v3281_v44 = vpop.f32.mrf.mxu0 }
 0x430   :  { %3300 = vst [vmem:[#allocation2 + $0x18] sm:$0xff] %v3296_v2  ;;  %v3294_v26 = vadd.f32 %v3281_v44, %v3177_v25 }
 0x432   :  { %3298 = vst [vmem:[#allocation2 + $0x8] sm:$0xff] %v3294_v26 }
 0x433   :  { %4433 = shalt.err (!%p4430_p4)
}
 0x434   :  { %s4447_s11 = smov 128   ;;  %s4448_s12 = smov 8  }
 0x435   :  { %3312 = dma.vmem_to_hbm [thread:$0]  %s3307_s9, 512, %s5554_s4, [#allocation3], %s4447_s11, %s4447_s11, %s4448_s12  }
 0x436   :  { %4442 = dma.done.wait [#allocation3], 512  }
 0x437   :  { %4443 = vsyncadd [#allocation3], 4294966784 }
 0x438   :  { %3316 = vsyncpa [#allocation3], 1 }

</bundles_post_ra>
